<compile_context>
chip_gen: v5e
topology: v5e:2x2
jax: 0.10.0
libtpu: 0.0.40
codegen_flags: <defaults>
</compile_context>

<pallas_src>
import jax
import jax.numpy as jnp
from jax import lax
from jax.experimental import pallas as pl
from jax.experimental.pallas import tpu as pltpu


def _round_up(a, b):
    return -(-a // b) * b


def _vmem_limit_bytes():
    try:
        cap = int(pltpu.get_tpu_info().vmem_capacity_bytes)
    except Exception:
        cap = 128 * 1024 * 1024
    # Generation-aware: <= ~48 MiB on v7x (64 MiB physical VMEM),
    # 80 MiB on v5e/v6e (128 MiB physical VMEM).
    return 48 * 1024 * 1024 if cap <= 96 * 1024 * 1024 else 80 * 1024 * 1024


def _pick_row_tile(ho, wo_p, cin, cout, n_out, fold_k, vmem_limit):
    """Pick the output-row tile so the per-step footprint (double-buffered
    inputs/outputs + f32 temporaries + resident weights) fits a VMEM budget."""
    budget = (vmem_limit * 3) // 4
    if fold_k:
        in_row = wo_p * 9 * cin * 2                      # (1, wo_p, 9cin) bf16 LHS slab
        tmp_row = wo_p * 9 * cin * 2                     # in-kernel LHS reshape copy
        fixed = 2 * 9 * cin * cout * 2                   # resident (9cin, cout) weights
    else:
        in_row = 4 * (wo_p + 1) * cin * 2                # four parity-phase rows, bf16
        tmp_row = 3 * (wo_p + 1) * cin * 2               # shifted phases + tap LHS copy
        fixed = 2 * (9 * cin * cout * 2 + 2 * (wo_p + 1) * cin * 2)   # weights + halos
    out_row = n_out * wo_p * cout * 2                    # bf16 outputs
    f32_row = 3 * wo_p * cout * 4                        # acc / relu / norm f32 temps
    per_row = 2 * (in_row + out_row) + tmp_row + f32_row
    tr = max(1, min(64, (budget - fixed) // per_row, ho))
    return int(tr)


# --------------------------------------------------------------------------
# Shared epilogue: ReLU + alignment-pad masking + channel-wise L2 norm
# (F.normalize(p=2, dim=channels), eps=1e-12; rsqrt runs on the EUP).
# --------------------------------------------------------------------------
def _epilogue(acc, out_refs, tr, wo_p, cout, emit_relu, need_mask, ho_v, wo_v):
    relu = jnp.maximum(acc, 0.0).reshape(tr, wo_p, cout)          # f32
    if need_mask:
        # Zero the alignment-padding rows/cols so padded outputs can be fed
        # directly to the next conv stage (its pad=1 semantics need zeros).
        row0 = pl.program_id(1) * tr
        rid = lax.broadcasted_iota(jnp.int32, (tr, wo_p, 1), 0) + row0
        cid = lax.broadcasted_iota(jnp.int32, (tr, wo_p, 1), 1)
        relu = jnp.where((rid < ho_v) & (cid < wo_v), relu, 0.0)
    if emit_relu:
        relu_ref, norm_ref = out_refs
        relu_ref[...] = relu.astype(relu_ref.dtype)
    else:
        (norm_ref,) = out_refs
    ss = jnp.sum(relu * relu, axis=-1, keepdims=True)
    # rsqrt(max(ss, 1e-24)) == 1 / max(||v||, 1e-12)  (F.normalize eps)
    inv = lax.rsqrt(jnp.maximum(ss, 1e-24))
    norm_ref[...] = (relu * inv).astype(norm_ref.dtype)


# --------------------------------------------------------------------------
# Small-Cin kernel: 3x3 taps folded into the matmul K dimension (K = 9*cin).
# x_ref : (tr, Wo_p, 9*Cin)   pre-gathered taps     w_ref : (9*Cin, Cout)
# --------------------------------------------------------------------------
def _make_fold_kernel(tr, wo_p, kin, cout, emit_relu, need_mask, ho_v, wo_v):
    def kernel(x_ref, w_ref, *out_refs):
        lhs = x_ref[...].reshape(tr * wo_p, kin)
        acc = jnp.dot(lhs, w_ref[...], preferred_element_type=jnp.float32)
        _epilogue(acc, out_refs, tr, wo_p, cout, emit_relu, need_mask, ho_v, wo_v)
    return kernel


# --------------------------------------------------------------------------
# Large-Cin kernel: parity-phase conv, 9 full-tile dots chained into one
# accumulation expression (rows folded into M = tr*Wo_p).
#   p00m/p01m/p10m/p11m : (tr, Wo_p+1, Cin)   phase rows [t*tr, t*tr+tr)
#   p00h/p01h           : (Wo_p+1, Cin)       halo row (t+1)*tr (kh == 2 taps)
#   w_ref               : (3, 3, Cin, Cout)   resident weights
# --------------------------------------------------------------------------
def _make_phase_kernel(tr, wo_p, cin, cout, emit_relu, need_mask, ho_v, wo_v):
    def kernel(p00m, p00h, p01m, p01h, p10m, p11m, w_ref, *out_refs):
        m00, m01 = p00m[...], p01m[...]
        m10, m11 = p10m[...], p11m[...]
        h00, h01 = p00h[...][None], p01h[...][None]
        # Row-shifted (qh == 1) views of the even-row phases, built once per tile.
        if tr > 1:
            s00 = jnp.concatenate([m00[1:], h00], axis=0)
            s01 = jnp.concatenate([m01[1:], h01], axis=0)
        else:
            s00, s01 = h00, h01
        srcs = {(0, 0, 0): m00, (0, 0, 1): m01,
                (0, 1, 0): m10, (0, 1, 1): m11,
                (1, 0, 0): s00, (1, 0, 1): s01}

        acc = None
        for kh in range(3):
            qh, ah = divmod(kh, 2)                 # tap row = 2*ho + kh
            for kw in range(3):
                qw, aw = divmod(kw, 2)             # tap col = 2*wo + kw
                lhs = srcs[(qh, ah, aw)][:, qw:qw + wo_p, :].reshape(tr * wo_p, cin)
                d = jnp.dot(lhs, w_ref[kh, kw], preferred_element_type=jnp.float32)
                acc = d if acc is None else acc + d
        _epilogue(acc, out_refs, tr, wo_p, cout, emit_relu, need_mask, ho_v, wo_v)
    return kernel


# --------------------------------------------------------------------------
# Fused conv3x3/s2/p1 + ReLU + channel-wise L2-normalization stage.
# --------------------------------------------------------------------------
def conv3x3_s2_relu_l2norm(x_nhwc, w_hwio, *, emit_relu, out_valid=None):
    """x: (N,H,W,Cin) (rows/cols beyond the previous stage's valid region must
    be zero), w: (3,3,Cin,Cout) HWIO.  Returns (relu_bf16 or None, norm_bf16,
    (ho, wo)); arrays are padded to (N, Ho_p, Wo_p, Cout) with exact zeros
    outside [:ho_valid, :wo_valid], so they can feed the next stage directly."""
    n, h, w, cin = x_nhwc.shape
    cout = w_hwio.shape[-1]
    ho = (h - 1) // 2 + 1
    wo = (w - 1) // 2 + 1
    wo_p = _round_up(wo, 8)                               # sublane-aligned
    if out_valid is None:
        out_valid = (ho, wo)
    ho_v, wo_v = out_valid

    fold_k = cin <= 16                                    # stage-1 style K-folding
    n_out = 2 if emit_relu else 1
    vmem_limit = _vmem_limit_bytes()
    tr = _pick_row_tile(ho, wo_p, cin, cout, n_out, fold_k, vmem_limit)
    ho_p = _round_up(ho, tr)
    n_rt = ho_p // tr
    need_mask = (ho_p > ho_v) or (wo_p > wo_v)

    # bf16 matmul inputs (MXU-native on v6e/v7x); f32 accumulation in-kernel.
    xb = x_nhwc.astype(jnp.bfloat16)
    hp, wp = 2 * ho_p + 2, 2 * wo_p + 2
    xp = jnp.pad(xb, ((0, 0), (1, hp - h - 1), (1, wp - w - 1), (0, 0)))

    out_bs = pl.BlockSpec((None, tr, wo_p, cout), lambda nn, t: (nn, t, 0, 0))
    out_shape, out_specs = [], []
    if emit_relu:
        out_shape.append(jax.ShapeDtypeStruct((n, ho_p, wo_p, cout), jnp.bfloat16))
        out_specs.append(out_bs)
    out_shape.append(jax.ShapeDtypeStruct((n, ho_p, wo_p, cout), jnp.bfloat16))
    out_specs.append(out_bs)

    if fold_k:
        # K-folded path (cin small): gather the 9 taps into a (.., 9*cin) slab.
        # TODO(synk): the tap gather is a host-side XLA layout pass (cheap at
        # cin<=16); an in-kernel strided gather would remove even that.
        taps = [xp[:, kh:kh + 2 * ho_p:2, kw:kw + 2 * wo_p:2, :]
                for kh in range(3) for kw in range(3)]
        lhs = jnp.concatenate(taps, axis=-1)              # (N, Ho_p, Wo_p, 9*Cin)
        wflat = w_hwio.reshape(9 * cin, cout).astype(jnp.bfloat16)
        inputs = (lhs, wflat)
        in_specs = [pl.BlockSpec((None, tr, wo_p, 9 * cin), lambda nn, t: (nn, t, 0, 0)),
                    pl.BlockSpec((9 * cin, cout), lambda nn, t: (0, 0))]
        kernel = _make_fold_kernel(tr, wo_p, 9 * cin, cout, emit_relu,
                                   need_mask, ho_v, wo_v)
    else:
        # Parity-phase path (cin large): ~1x layout pass, 9 accumulated dots.
        p00 = xp[:, 0::2, 0::2, :]                        # (N, Ho_p+1, Wo_p+1, Cin)
        p01 = xp[:, 0::2, 1::2, :]
        p10 = xp[:, 1::2, 0::2, :]
        p11 = xp[:, 1::2, 1::2, :]
        wb = w_hwio.astype(jnp.bfloat16)
        main_bs = pl.BlockSpec((None, tr, wo_p + 1, cin), lambda nn, t: (nn, t, 0, 0))
        halo_bs = pl.BlockSpec((None, None, wo_p + 1, cin),
                               lambda nn, t: (nn, (t + 1) * tr, 0, 0))
        w_bs = pl.BlockSpec((3, 3, cin, cout), lambda nn, t: (0, 0, 0, 0))
        inputs = (p00, p00, p01, p01, p10, p11, wb)
        in_specs = [main_bs, halo_bs, main_bs, halo_bs, main_bs, main_bs, w_bs]
        kernel = _make_phase_kernel(tr, wo_p, cin, cout, emit_relu,
                                    need_mask, ho_v, wo_v)

    res = pl.pallas_call(
        kernel,
        out_shape=tuple(out_shape),
        grid_spec=pl.GridSpec(grid=(n, n_rt), in_specs=in_specs,
                              out_specs=tuple(out_specs)),
        compiler_params=pltpu.CompilerParams(
            dimension_semantics=("parallel", "parallel"),
            vmem_limit_bytes=vmem_limit),
    )(*inputs)

    if not isinstance(res, (list, tuple)):
        res = (res,)
    norm = res[-1]
    relu = res[0] if emit_relu else None
    return relu, norm, (ho, wo)


# --------------------------------------------------------------------------
# BASE.forward equivalent (synthetic 2-stage encoder stub)
# --------------------------------------------------------------------------
def init_params(key, cin=4, c1=128, c2=128):
    # Channel widths chosen lane-dense (multiples of 128) so conv / normalize
    # outputs use full-width unmasked vector stores.
    k1, k2 = jax.random.split(key)
    return {
        "w1": 0.1 * jax.random.normal(k1, (3, 3, cin, c1), jnp.float32),
        "w2": 0.1 * jax.random.normal(k2, (3, 3, c1, c2), jnp.float32),
    }


def base_forward(x_nchw, params):
    """x_nchw: (N, Cin, H, W).  Returns dict of NCHW feature maps, each
    L2-normalized over channels (PyTorch F.normalize(p=2, dim=1))."""
    x = jnp.transpose(x_nchw, (0, 2, 3, 1))                       # -> NHWC
    relu1, norm1, (h1, w1) = conv3x3_s2_relu_l2norm(x, params["w1"], emit_relu=True)
    h2, w2 = (h1 - 1) // 2 + 1, (w1 - 1) // 2 + 1
    # Stage 2 consumes the PADDED stage-1 relu directly (its alignment padding
    # is exact zeros), so no slice / re-pad HBM round trip between stages.
    _, norm2, _ = conv3x3_s2_relu_l2norm(relu1, params["w2"], emit_relu=False,
                                         out_valid=(h2, w2))
    to_nchw = lambda v, hh, ww: jnp.transpose(v[:, :hh, :ww, :], (0, 3, 1, 2))
    return {"layer1": to_nchw(norm1, h1, w1), "layer2": to_nchw(norm2, h2, w2)}


if __name__ == "__main__":
    key = jax.random.PRNGKey(0)
    kx, kp = jax.random.split(key)
    x = jax.random.normal(kx, (2, 4, 16, 16), jnp.float32)        # NCHW
    params = init_params(kp)

    outs = jax.jit(base_forward)(x, params)
    for v in outs.values():
        jax.block_until_ready(v)

    # Pure-XLA f32 reference (conv -> relu -> normalize) for correctness.
    def ref_forward(xr, pr):
        def conv(inp, wt):
            y = lax.conv_general_dilated(
                inp, wt, window_strides=(2, 2), padding=((1, 1), (1, 1)),
                dimension_numbers=("NCHW", "HWIO", "NCHW"),
                precision=lax.Precision.HIGHEST)
            return jnp.maximum(y, 0.0)
        f1 = conv(xr, pr["w1"])
        f2 = conv(f1, pr["w2"])
        l2n = lambda v: v / jnp.maximum(
            jnp.sqrt(jnp.sum(v * v, axis=1, keepdims=True)), 1e-12)
        return {"layer1": l2n(f1), "layer2": l2n(f2)}

    refs = ref_forward(x, params)
    for k, v in outs.items():
        v32 = v.astype(jnp.float32)
        assert bool(jnp.all(jnp.isfinite(v32))), f"non-finite values in {k}"
        nrm = jnp.linalg.norm(v32, axis=1)                        # (N, H, W)
        ok = jnp.all((jnp.abs(nrm - 1.0) < 1e-2) | (nrm < 1e-6))
        assert bool(ok), f"normalization check failed for {k}"
        err = float(jnp.max(jnp.abs(v32 - refs[k])))
        assert err < 5e-2, f"mismatch vs reference for {k}: max err {err}"

    print("KERNEL_OK")
</pallas_src>

<mosaic_0001>
module attributes {stable_mosaic.version = 11 : i64} {
  func.func @kernel(%arg0: i32, %arg1: i32, %arg2: memref<1x8x8x36xbf16, #tpu.memory_space<vmem>>, %arg3: memref<36x128xbf16, #tpu.memory_space<vmem>>, %arg4: memref<1x8x8x128xbf16, #tpu.memory_space<vmem>>, %arg5: memref<1x8x8x128xbf16, #tpu.memory_space<vmem>>) attributes {dimension_semantics = [#tpu.dimension_semantics<parallel>, #tpu.dimension_semantics<parallel>], iteration_bounds = array<i64: 2, 1>, scalar_prefetch = 0 : i64, scratch_operands = 0 : i64, tpu.core_type = #tpu.core_type<tc>, window_params = [{transform_indices = @transform_0, window_bounds = array<i64: 1, 8, 8, 36>}, {pipeline_mode = #tpu.pipeline_mode<synchronous>, transform_indices = @transform_1, window_bounds = array<i64: 36, 128>}, {transform_indices = @transform_2, window_bounds = array<i64: 1, 8, 8, 128>}, {transform_indices = @transform_3, window_bounds = array<i64: 1, 8, 8, 128>}]} {
    %c0 = arith.constant 0 : index
    %c0_0 = arith.constant 0 : index
    %c0_1 = arith.constant 0 : index
    %c0_2 = arith.constant 0 : index
    %0 = vector.load %arg2[%c0, %c0_0, %c0_1, %c0_2] : memref<1x8x8x36xbf16, #tpu.memory_space<vmem>>, vector<1x8x8x36xbf16>
    %1 = vector.shape_cast %0 : vector<1x8x8x36xbf16> to vector<8x8x36xbf16>
    %2 = vector.shape_cast %1 : vector<8x8x36xbf16> to vector<64x36xbf16>
    %c0_3 = arith.constant 0 : index
    %c0_4 = arith.constant 0 : index
    %3 = vector.load %arg3[%c0_3, %c0_4] : memref<36x128xbf16, #tpu.memory_space<vmem>>, vector<36x128xbf16>
    %cst = arith.constant dense<0.000000e+00> : vector<64x128xf32>
    %4 = tpu.matmul %2, %3, %cst {dimension_numbers = #tpu.dot_dimension_numbers<[1], [0], [0], [1], [0, 0, 1, 1], [], []>} : vector<64x36xbf16>, vector<36x128xbf16>, vector<64x128xf32> -> vector<64x128xf32>
    %cst_5 = arith.constant 0.000000e+00 : f32
    %5 = vector.broadcast %cst_5 : f32 to vector<64x128xf32>
    %6 = arith.maximumf %4, %5 : vector<64x128xf32>
    %7 = vector.shape_cast %6 : vector<64x128xf32> to vector<8x8x128xf32>
    %8 = arith.truncf %7 : vector<8x8x128xf32> to vector<8x8x128xbf16>
    %c0_6 = arith.constant 0 : index
    %c0_7 = arith.constant 0 : index
    %c0_8 = arith.constant 0 : index
    %c0_9 = arith.constant 0 : index
    %9 = vector.load %arg4[%c0_6, %c0_7, %c0_8, %c0_9] : memref<1x8x8x128xbf16, #tpu.memory_space<vmem>>, vector<1x8x8x128xbf16>
    %10 = vector.shape_cast %9 : vector<1x8x8x128xbf16> to vector<8x8x128xbf16>
    %11 = vector.shape_cast %8 : vector<8x8x128xbf16> to vector<1x8x8x128xbf16>
    tpu.vector_store %arg4[%c0_6, %c0_7, %c0_8, %c0_9], %11 {strides = array<i32>} : memref<1x8x8x128xbf16, #tpu.memory_space<vmem>>, vector<1x8x8x128xbf16>,
    %12 = arith.mulf %7, %7 : vector<8x8x128xf32>
    %cst_10 = arith.constant dense<0.000000e+00> : vector<8x8xf32>
    %13 = vector.multi_reduction <add>, %12, %cst_10 [2] : vector<8x8x128xf32> to vector<8x8xf32>
    %14 = vector.shape_cast %13 : vector<8x8xf32> to vector<8x8x1xf32>
    %cst_11 = arith.constant 1.000000e-24 : f32
    %15 = vector.broadcast %cst_11 : f32 to vector<8x8x1xf32>
    %16 = arith.maximumf %14, %15 : vector<8x8x1xf32>
    %17 = math.rsqrt %16 : vector<8x8x1xf32>
    %18 = vector.broadcast %17 : vector<8x8x1xf32> to vector<8x8x128xf32>
    %19 = arith.mulf %7, %18 : vector<8x8x128xf32>
    %20 = arith.truncf %19 : vector<8x8x128xf32> to vector<8x8x128xbf16>
    %c0_12 = arith.constant 0 : index
    %c0_13 = arith.constant 0 : index
    %c0_14 = arith.constant 0 : index
    %c0_15 = arith.constant 0 : index
    %21 = vector.load %arg5[%c0_12, %c0_13, %c0_14, %c0_15] : memref<1x8x8x128xbf16, #tpu.memory_space<vmem>>, vector<1x8x8x128xbf16>
    %22 = vector.shape_cast %21 : vector<1x8x8x128xbf16> to vector<8x8x128xbf16>
    %23 = vector.shape_cast %20 : vector<8x8x128xbf16> to vector<1x8x8x128xbf16>
    tpu.vector_store %arg5[%c0_12, %c0_13, %c0_14, %c0_15], %23 {strides = array<i32>} : memref<1x8x8x128xbf16, #tpu.memory_space<vmem>>, vector<1x8x8x128xbf16>,
    return
  }
  func.func @transform_0(%arg0: i32, %arg1: i32) -> (i32, i32, i32, i32) {
    %c0_i32 = arith.constant 0 : i32
    %c0_i32_0 = arith.constant 0 : i32
    %c0_i32_1 = arith.constant 0 : i32
    return %arg0, %arg1, %c0_i32, %c0_i32_0 : i32, i32, i32, i32
  }
  func.func @transform_1(%arg0: i32, %arg1: i32) -> (i32, i32) {
    %c0_i32 = arith.constant 0 : i32
    %c0_i32_0 = arith.constant 0 : i32
    %c0_i32_1 = arith.constant 0 : i32
    return %c0_i32, %c0_i32_0 : i32, i32
  }
  func.func @transform_2(%arg0: i32, %arg1: i32) -> (i32, i32, i32, i32) {
    %c0_i32 = arith.constant 0 : i32
    %c0_i32_0 = arith.constant 0 : i32
    %c0_i32_1 = arith.constant 0 : i32
    return %arg0, %arg1, %c0_i32, %c0_i32_0 : i32, i32, i32, i32
  }
  func.func @transform_3(%arg0: i32, %arg1: i32) -> (i32, i32, i32, i32) {
    %c0_i32 = arith.constant 0 : i32
    %c0_i32_0 = arith.constant 0 : i32
    %c0_i32_1 = arith.constant 0 : i32
    return %arg0, %arg1, %c0_i32, %c0_i32_0 : i32, i32, i32, i32
  }
}

module attributes {stable_mosaic.version = 11 : i64} {
  func.func @kernel(%arg0: i32, %arg1: i32, %arg2: memref<1x4x9x128xbf16, #tpu.memory_space<vmem>>, %arg3: memref<1x1x9x128xbf16, #tpu.memory_space<vmem>>, %arg4: memref<1x4x9x128xbf16, #tpu.memory_space<vmem>>, %arg5: memref<1x1x9x128xbf16, #tpu.memory_space<vmem>>, %arg6: memref<1x4x9x128xbf16, #tpu.memory_space<vmem>>, %arg7: memref<1x4x9x128xbf16, #tpu.memory_space<vmem>>, %arg8: memref<3x3x128x128xbf16, #tpu.memory_space<vmem>>, %arg9: memref<1x4x8x128xbf16, #tpu.memory_space<vmem>>) attributes {dimension_semantics = [#tpu.dimension_semantics<parallel>, #tpu.dimension_semantics<parallel>], iteration_bounds = array<i64: 2, 1>, scalar_prefetch = 0 : i64, scratch_operands = 0 : i64, tpu.core_type = #tpu.core_type<tc>, window_params = [{transform_indices = @transform_0, window_bounds = array<i64: 1, 4, 9, 128>}, {transform_indices = @transform_1, window_bounds = array<i64: 1, 1, 9, 128>}, {transform_indices = @transform_2, window_bounds = array<i64: 1, 4, 9, 128>}, {transform_indices = @transform_3, window_bounds = array<i64: 1, 1, 9, 128>}, {transform_indices = @transform_4, window_bounds = array<i64: 1, 4, 9, 128>}, {transform_indices = @transform_5, window_bounds = array<i64: 1, 4, 9, 128>}, {pipeline_mode = #tpu.pipeline_mode<synchronous>, transform_indices = @transform_6, window_bounds = array<i64: 3, 3, 128, 128>}, {transform_indices = @transform_7, window_bounds = array<i64: 1, 4, 8, 128>}]} {
    %c0 = arith.constant 0 : index
    %c0_0 = arith.constant 0 : index
    %c0_1 = arith.constant 0 : index
    %c0_2 = arith.constant 0 : index
    %0 = vector.load %arg2[%c0, %c0_0, %c0_1, %c0_2] : memref<1x4x9x128xbf16, #tpu.memory_space<vmem>>, vector<1x4x9x128xbf16>
    %1 = vector.shape_cast %0 : vector<1x4x9x128xbf16> to vector<4x9x128xbf16>
    %c0_3 = arith.constant 0 : index
    %c0_4 = arith.constant 0 : index
    %c0_5 = arith.constant 0 : index
    %c0_6 = arith.constant 0 : index
    %2 = vector.load %arg4[%c0_3, %c0_4, %c0_5, %c0_6] : memref<1x4x9x128xbf16, #tpu.memory_space<vmem>>, vector<1x4x9x128xbf16>
    %3 = vector.shape_cast %2 : vector<1x4x9x128xbf16> to vector<4x9x128xbf16>
    %c0_7 = arith.constant 0 : index
    %c0_8 = arith.constant 0 : index
    %c0_9 = arith.constant 0 : index
    %c0_10 = arith.constant 0 : index
    %4 = vector.load %arg6[%c0_7, %c0_8, %c0_9, %c0_10] : memref<1x4x9x128xbf16, #tpu.memory_space<vmem>>, vector<1x4x9x128xbf16>
    %5 = vector.shape_cast %4 : vector<1x4x9x128xbf16> to vector<4x9x128xbf16>
    %c0_11 = arith.constant 0 : index
    %c0_12 = arith.constant 0 : index
    %c0_13 = arith.constant 0 : index
    %c0_14 = arith.constant 0 : index
    %6 = vector.load %arg7[%c0_11, %c0_12, %c0_13, %c0_14] : memref<1x4x9x128xbf16, #tpu.memory_space<vmem>>, vector<1x4x9x128xbf16>
    %7 = vector.shape_cast %6 : vector<1x4x9x128xbf16> to vector<4x9x128xbf16>
    %c0_15 = arith.constant 0 : index
    %c0_16 = arith.constant 0 : index
    %c0_17 = arith.constant 0 : index
    %c0_18 = arith.constant 0 : index
    %8 = vector.load %arg3[%c0_15, %c0_16, %c0_17, %c0_18] : memref<1x1x9x128xbf16, #tpu.memory_space<vmem>>, vector<1x1x9x128xbf16>
    %9 = vector.shape_cast %8 : vector<1x1x9x128xbf16> to vector<9x128xbf16>
    %10 = vector.shape_cast %9 : vector<9x128xbf16> to vector<1x9x128xbf16>
    %c0_19 = arith.constant 0 : index
    %c0_20 = arith.constant 0 : index
    %c0_21 = arith.constant 0 : index
    %c0_22 = arith.constant 0 : index
    %11 = vector.load %arg5[%c0_19, %c0_20, %c0_21, %c0_22] : memref<1x1x9x128xbf16, #tpu.memory_space<vmem>>, vector<1x1x9x128xbf16>
    %12 = vector.shape_cast %11 : vector<1x1x9x128xbf16> to vector<9x128xbf16>
    %13 = vector.shape_cast %12 : vector<9x128xbf16> to vector<1x9x128xbf16>
    %14 = vector.extract_strided_slice %1 {offsets = [1, 0, 0], sizes = [3, 9, 128], strides = [1, 1, 1]} : vector<4x9x128xbf16> to vector<3x9x128xbf16>
    %15 = tpu.concatenate %14, %10 in 0 : vector<3x9x128xbf16>, vector<1x9x128xbf16> -> vector<4x9x128xbf16>
    %16 = vector.extract_strided_slice %3 {offsets = [1, 0, 0], sizes = [3, 9, 128], strides = [1, 1, 1]} : vector<4x9x128xbf16> to vector<3x9x128xbf16>
    %17 = tpu.concatenate %16, %13 in 0 : vector<3x9x128xbf16>, vector<1x9x128xbf16> -> vector<4x9x128xbf16>
    %18 = vector.extract_strided_slice %1 {offsets = [0, 0, 0], sizes = [4, 8, 128], strides = [1, 1, 1]} : vector<4x9x128xbf16> to vector<4x8x128xbf16>
    %19 = vector.shape_cast %18 : vector<4x8x128xbf16> to vector<32x128xbf16>
    %c0_23 = arith.constant 0 : index
    %c0_24 = arith.constant 0 : index
    %c0_25 = arith.constant 0 : index
    %c0_26 = arith.constant 0 : index
    %20 = vector.load %arg8[%c0_23, %c0_24, %c0_25, %c0_26] : memref<3x3x128x128xbf16, #tpu.memory_space<vmem>>, vector<1x1x128x128xbf16>
    %21 = vector.shape_cast %20 : vector<1x1x128x128xbf16> to vector<128x128xbf16>
    %cst = arith.constant dense<0.000000e+00> : vector<32x128xf32>
    %22 = tpu.matmul %19, %21, %cst {dimension_numbers = #tpu.dot_dimension_numbers<[1], [0], [0], [1], [0, 0, 1, 1], [], []>} : vector<32x128xbf16>, vector<128x128xbf16>, vector<32x128xf32> -> vector<32x128xf32>
    %23 = vector.extract_strided_slice %3 {offsets = [0, 0, 0], sizes = [4, 8, 128], strides = [1, 1, 1]} : vector<4x9x128xbf16> to vector<4x8x128xbf16>
    %24 = vector.shape_cast %23 : vector<4x8x128xbf16> to vector<32x128xbf16>
    %c0_27 = arith.constant 0 : index
    %c1 = arith.constant 1 : index
    %c0_28 = arith.constant 0 : index
    %c0_29 = arith.constant 0 : index
    %25 = vector.load %arg8[%c0_27, %c1, %c0_28, %c0_29] : memref<3x3x128x128xbf16, #tpu.memory_space<vmem>>, vector<1x1x128x128xbf16>
    %26 = vector.shape_cast %25 : vector<1x1x128x128xbf16> to vector<128x128xbf16>
    %cst_30 = arith.constant dense<0.000000e+00> : vector<32x128xf32>
    %27 = tpu.matmul %24, %26, %cst_30 {dimension_numbers = #tpu.dot_dimension_numbers<[1], [0], [0], [1], [0, 0, 1, 1], [], []>} : vector<32x128xbf16>, vector<128x128xbf16>, vector<32x128xf32> -> vector<32x128xf32>
    %28 = arith.addf %22, %27 : vector<32x128xf32>
    %29 = vector.extract_strided_slice %1 {offsets = [0, 1, 0], sizes = [4, 8, 128], strides = [1, 1, 1]} : vector<4x9x128xbf16> to vector<4x8x128xbf16>
    %30 = vector.shape_cast %29 : vector<4x8x128xbf16> to vector<32x128xbf16>
    %c0_31 = arith.constant 0 : index
    %c2 = arith.constant 2 : index
    %c0_32 = arith.constant 0 : index
    %c0_33 = arith.constant 0 : index
    %31 = vector.load %arg8[%c0_31, %c2, %c0_32, %c0_33] : memref<3x3x128x128xbf16, #tpu.memory_space<vmem>>, vector<1x1x128x128xbf16>
    %32 = vector.shape_cast %31 : vector<1x1x128x128xbf16> to vector<128x128xbf16>
    %cst_34 = arith.constant dense<0.000000e+00> : vector<32x128xf32>
    %33 = tpu.matmul %30, %32, %cst_34 {dimension_numbers = #tpu.dot_dimension_numbers<[1], [0], [0], [1], [0, 0, 1, 1], [], []>} : vector<32x128xbf16>, vector<128x128xbf16>, vector<32x128xf32> -> vector<32x128xf32>
    %34 = arith.addf %28, %33 : vector<32x128xf32>
    %35 = vector.extract_strided_slice %5 {offsets = [0, 0, 0], sizes = [4, 8, 128], strides = [1, 1, 1]} : vector<4x9x128xbf16> to vector<4x8x128xbf16>
    %36 = vector.shape_cast %35 : vector<4x8x128xbf16> to vector<32x128xbf16>
    %c1_35 = arith.constant 1 : index
    %c0_36 = arith.constant 0 : index
    %c0_37 = arith.constant 0 : index
    %c0_38 = arith.constant 0 : index
    %37 = vector.load %arg8[%c1_35, %c0_36, %c0_37, %c0_38] : memref<3x3x128x128xbf16, #tpu.memory_space<vmem>>, vector<1x1x128x128xbf16>
    %38 = vector.shape_cast %37 : vector<1x1x128x128xbf16> to vector<128x128xbf16>
    %cst_39 = arith.constant dense<0.000000e+00> : vector<32x128xf32>
    %39 = tpu.matmul %36, %38, %cst_39 {dimension_numbers = #tpu.dot_dimension_numbers<[1], [0], [0], [1], [0, 0, 1, 1], [], []>} : vector<32x128xbf16>, vector<128x128xbf16>, vector<32x128xf32> -> vector<32x128xf32>
    %40 = arith.addf %34, %39 : vector<32x128xf32>
    %41 = vector.extract_strided_slice %7 {offsets = [0, 0, 0], sizes = [4, 8, 128], strides = [1, 1, 1]} : vector<4x9x128xbf16> to vector<4x8x128xbf16>
    %42 = vector.shape_cast %41 : vector<4x8x128xbf16> to vector<32x128xbf16>
    %c1_40 = arith.constant 1 : index
    %c1_41 = arith.constant 1 : index
    %c0_42 = arith.constant 0 : index
    %c0_43 = arith.constant 0 : index
    %43 = vector.load %arg8[%c1_40, %c1_41, %c0_42, %c0_43] : memref<3x3x128x128xbf16, #tpu.memory_space<vmem>>, vector<1x1x128x128xbf16>
    %44 = vector.shape_cast %43 : vector<1x1x128x128xbf16> to vector<128x128xbf16>
    %cst_44 = arith.constant dense<0.000000e+00> : vector<32x128xf32>
    %45 = tpu.matmul %42, %44, %cst_44 {dimension_numbers = #tpu.dot_dimension_numbers<[1], [0], [0], [1], [0, 0, 1, 1], [], []>} : vector<32x128xbf16>, vector<128x128xbf16>, vector<32x128xf32> -> vector<32x128xf32>
    %46 = arith.addf %40, %45 : vector<32x128xf32>
    %47 = vector.extract_strided_slice %5 {offsets = [0, 1, 0], sizes = [4, 8, 128], strides = [1, 1, 1]} : vector<4x9x128xbf16> to vector<4x8x128xbf16>
    %48 = vector.shape_cast %47 : vector<4x8x128xbf16> to vector<32x128xbf16>
    %c1_45 = arith.constant 1 : index
    %c2_46 = arith.constant 2 : index
    %c0_47 = arith.constant 0 : index
    %c0_48 = arith.constant 0 : index
    %49 = vector.load %arg8[%c1_45, %c2_46, %c0_47, %c0_48] : memref<3x3x128x128xbf16, #tpu.memory_space<vmem>>, vector<1x1x128x128xbf16>
    %50 = vector.shape_cast %49 : vector<1x1x128x128xbf16> to vector<128x128xbf16>
    %cst_49 = arith.constant dense<0.000000e+00> : vector<32x128xf32>
    %51 = tpu.matmul %48, %50, %cst_49 {dimension_numbers = #tpu.dot_dimension_numbers<[1], [0], [0], [1], [0, 0, 1, 1], [], []>} : vector<32x128xbf16>, vector<128x128xbf16>, vector<32x128xf32> -> vector<32x128xf32>
    %52 = arith.addf %46, %51 : vector<32x128xf32>
    %53 = vector.extract_strided_slice %15 {offsets = [0, 0, 0], sizes = [4, 8, 128], strides = [1, 1, 1]} : vector<4x9x128xbf16> to vector<4x8x128xbf16>
    %54 = vector.shape_cast %53 : vector<4x8x128xbf16> to vector<32x128xbf16>
    %c2_50 = arith.constant 2 : index
    %c0_51 = arith.constant 0 : index
    %c0_52 = arith.constant 0 : index
    %c0_53 = arith.constant 0 : index
    %55 = vector.load %arg8[%c2_50, %c0_51, %c0_52, %c0_53] : memref<3x3x128x128xbf16, #tpu.memory_space<vmem>>, vector<1x1x128x128xbf16>
    %56 = vector.shape_cast %55 : vector<1x1x128x128xbf16> to vector<128x128xbf16>
    %cst_54 = arith.constant dense<0.000000e+00> : vector<32x128xf32>
    %57 = tpu.matmul %54, %56, %cst_54 {dimension_numbers = #tpu.dot_dimension_numbers<[1], [0], [0], [1], [0, 0, 1, 1], [], []>} : vector<32x128xbf16>, vector<128x128xbf16>, vector<32x128xf32> -> vector<32x128xf32>
    %58 = arith.addf %52, %57 : vector<32x128xf32>
    %59 = vector.extract_strided_slice %17 {offsets = [0, 0, 0], sizes = [4, 8, 128], strides = [1, 1, 1]} : vector<4x9x128xbf16> to vector<4x8x128xbf16>
    %60 = vector.shape_cast %59 : vector<4x8x128xbf16> to vector<32x128xbf16>
    %c2_55 = arith.constant 2 : index
    %c1_56 = arith.constant 1 : index
    %c0_57 = arith.constant 0 : index
    %c0_58 = arith.constant 0 : index
    %61 = vector.load %arg8[%c2_55, %c1_56, %c0_57, %c0_58] : memref<3x3x128x128xbf16, #tpu.memory_space<vmem>>, vector<1x1x128x128xbf16>
    %62 = vector.shape_cast %61 : vector<1x1x128x128xbf16> to vector<128x128xbf16>
    %cst_59 = arith.constant dense<0.000000e+00> : vector<32x128xf32>
    %63 = tpu.matmul %60, %62, %cst_59 {dimension_numbers = #tpu.dot_dimension_numbers<[1], [0], [0], [1], [0, 0, 1, 1], [], []>} : vector<32x128xbf16>, vector<128x128xbf16>, vector<32x128xf32> -> vector<32x128xf32>
    %64 = arith.addf %58, %63 : vector<32x128xf32>
    %65 = vector.extract_strided_slice %15 {offsets = [0, 1, 0], sizes = [4, 8, 128], strides = [1, 1, 1]} : vector<4x9x128xbf16> to vector<4x8x128xbf16>
    %66 = vector.shape_cast %65 : vector<4x8x128xbf16> to vector<32x128xbf16>
    %c2_60 = arith.constant 2 : index
    %c2_61 = arith.constant 2 : index
    %c0_62 = arith.constant 0 : index
    %c0_63 = arith.constant 0 : index
    %67 = vector.load %arg8[%c2_60, %c2_61, %c0_62, %c0_63] : memref<3x3x128x128xbf16, #tpu.memory_space<vmem>>, vector<1x1x128x128xbf16>
    %68 = vector.shape_cast %67 : vector<1x1x128x128xbf16> to vector<128x128xbf16>
    %cst_64 = arith.constant dense<0.000000e+00> : vector<32x128xf32>
    %69 = tpu.matmul %66, %68, %cst_64 {dimension_numbers = #tpu.dot_dimension_numbers<[1], [0], [0], [1], [0, 0, 1, 1], [], []>} : vector<32x128xbf16>, vector<128x128xbf16>, vector<32x128xf32> -> vector<32x128xf32>
    %70 = arith.addf %64, %69 : vector<32x128xf32>
    %cst_65 = arith.constant 0.000000e+00 : f32
    %71 = vector.broadcast %cst_65 : f32 to vector<32x128xf32>
    %72 = arith.maximumf %70, %71 : vector<32x128xf32>
    %73 = vector.shape_cast %72 : vector<32x128xf32> to vector<4x8x128xf32>
    %c4_i32 = arith.constant 4 : i32
    %74 = arith.muli %arg1, %c4_i32 : i32
    %75 = tpu.iota {dimensions = array<i32: 0>} : vector<4x8x1xi32>
    %76 = vector.broadcast %74 : i32 to vector<4x8x1xi32>
    %77 = arith.addi %75, %76 : vector<4x8x1xi32>
    %78 = tpu.iota {dimensions = array<i32: 1>} : vector<4x8x1xi32>
    %c4_i32_66 = arith.constant 4 : i32
    %79 = vector.broadcast %c4_i32_66 : i32 to vector<4x8x1xi32>
    %80 = arith.cmpi slt, %77, %79 : vector<4x8x1xi32>
    %c4_i32_67 = arith.constant 4 : i32
    %81 = vector.broadcast %c4_i32_67 : i32 to vector<4x8x1xi32>
    %82 = arith.cmpi slt, %78, %81 : vector<4x8x1xi32>
    %83 = arith.andi %80, %82 : vector<4x8x1xi1>
    %cst_68 = arith.constant 0.000000e+00 : f32
    %84 = vector.shape_cast %83 : vector<4x8x1xi1> to vector<4x8x1xi1>
    %85 = vector.broadcast %84 : vector<4x8x1xi1> to vector<4x8x128xi1>
    %86 = vector.broadcast %cst_68 : f32 to vector<4x8x128xf32>
    %87 = arith.select %85, %73, %86 : vector<4x8x128xi1>, vector<4x8x128xf32>
    %88 = arith.mulf %87, %87 : vector<4x8x128xf32>
    %cst_69 = arith.constant dense<0.000000e+00> : vector<4x8xf32>
    %89 = vector.multi_reduction <add>, %88, %cst_69 [2] : vector<4x8x128xf32> to vector<4x8xf32>
    %90 = vector.shape_cast %89 : vector<4x8xf32> to vector<4x8x1xf32>
    %cst_70 = arith.constant 1.000000e-24 : f32
    %91 = vector.broadcast %cst_70 : f32 to vector<4x8x1xf32>
    %92 = arith.maximumf %90, %91 : vector<4x8x1xf32>
    %93 = math.rsqrt %92 : vector<4x8x1xf32>
    %94 = vector.broadcast %93 : vector<4x8x1xf32> to vector<4x8x128xf32>
    %95 = arith.mulf %87, %94 : vector<4x8x128xf32>
    %96 = arith.truncf %95 : vector<4x8x128xf32> to vector<4x8x128xbf16>
    %c0_71 = arith.constant 0 : index
    %c0_72 = arith.constant 0 : index
    %c0_73 = arith.constant 0 : index
    %c0_74 = arith.constant 0 : index
    %97 = vector.load %arg9[%c0_71, %c0_72, %c0_73, %c0_74] : memref<1x4x8x128xbf16, #tpu.memory_space<vmem>>, vector<1x4x8x128xbf16>
    %98 = vector.shape_cast %97 : vector<1x4x8x128xbf16> to vector<4x8x128xbf16>
    %99 = vector.shape_cast %96 : vector<4x8x128xbf16> to vector<1x4x8x128xbf16>
    tpu.vector_store %arg9[%c0_71, %c0_72, %c0_73, %c0_74], %99 {strides = array<i32>} : memref<1x4x8x128xbf16, #tpu.memory_space<vmem>>, vector<1x4x8x128xbf16>,
    return
  }
  func.func @transform_0(%arg0: i32, %arg1: i32) -> (i32, i32, i32, i32) {
    %c0_i32 = arith.constant 0 : i32
    %c0_i32_0 = arith.constant 0 : i32
    %c0_i32_1 = arith.constant 0 : i32
    return %arg0, %arg1, %c0_i32, %c0_i32_0 : i32, i32, i32, i32
  }
  func.func @transform_1(%arg0: i32, %arg1: i32) -> (i32, i32, i32, i32) {
    %c1_i32 = arith.constant 1 : i32
    %0 = arith.addi %arg1, %c1_i32 : i32
    %c4_i32 = arith.constant 4 : i32
    %1 = arith.muli %0, %c4_i32 : i32
    %c0_i32 = arith.constant 0 : i32
    %c0_i32_0 = arith.constant 0 : i32
    %c0_i32_1 = arith.constant 0 : i32
    return %arg0, %1, %c0_i32, %c0_i32_0 : i32, i32, i32, i32
  }
  func.func @transform_2(%arg0: i32, %arg1: i32) -> (i32, i32, i32, i32) {
    %c0_i32 = arith.constant 0 : i32
    %c0_i32_0 = arith.constant 0 : i32
    %c0_i32_1 = arith.constant 0 : i32
    return %arg0, %arg1, %c0_i32, %c0_i32_0 : i32, i32, i32, i32
  }
  func.func @transform_3(%arg0: i32, %arg1: i32) -> (i32, i32, i32, i32) {
    %c1_i32 = arith.constant 1 : i32
    %0 = arith.addi %arg1, %c1_i32 : i32
    %c4_i32 = arith.constant 4 : i32
    %1 = arith.muli %0, %c4_i32 : i32
    %c0_i32 = arith.constant 0 : i32
    %c0_i32_0 = arith.constant 0 : i32
    %c0_i32_1 = arith.constant 0 : i32
    return %arg0, %1, %c0_i32, %c0_i32_0 : i32, i32, i32, i32
  }
  func.func @transform_4(%arg0: i32, %arg1: i32) -> (i32, i32, i32, i32) {
    %c0_i32 = arith.constant 0 : i32
    %c0_i32_0 = arith.constant 0 : i32
    %c0_i32_1 = arith.constant 0 : i32
    return %arg0, %arg1, %c0_i32, %c0_i32_0 : i32, i32, i32, i32
  }
  func.func @transform_5(%arg0: i32, %arg1: i32) -> (i32, i32, i32, i32) {
    %c0_i32 = arith.constant 0 : i32
    %c0_i32_0 = arith.constant 0 : i32
    %c0_i32_1 = arith.constant 0 : i32
    return %arg0, %arg1, %c0_i32, %c0_i32_0 : i32, i32, i32, i32
  }
  func.func @transform_6(%arg0: i32, %arg1: i32) -> (i32, i32, i32, i32) {
    %c0_i32 = arith.constant 0 : i32
    %c0_i32_0 = arith.constant 0 : i32
    %c0_i32_1 = arith.constant 0 : i32
    %c0_i32_2 = arith.constant 0 : i32
    %c0_i32_3 = arith.constant 0 : i32
    return %c0_i32, %c0_i32_0, %c0_i32_1, %c0_i32_2 : i32, i32, i32, i32
  }
  func.func @transform_7(%arg0: i32, %arg1: i32) -> (i32, i32, i32, i32) {
    %c0_i32 = arith.constant 0 : i32
    %c0_i32_0 = arith.constant 0 : i32
    %c0_i32_1 = arith.constant 0 : i32
    return %arg0, %arg1, %c0_i32, %c0_i32_0 : i32, i32, i32, i32
  }
}

</mosaic_0001>

<bundles_post_ra>
// kernel: base_forward.2
= control target key start
LH: loop header
LB: loop body
LE: loop exit
PB: predicated region body
PF: predicated region fallthrough
CT: control target
= control target key end

     0   :  { %9 = vsyncpa [#allocation3], 0  ;;  %s1150_s0 = inlined_call_operand.vmem [shape: bf16[2,8,8,36], index: 0, kind: input, shape index: {}]   ;;  %s1151_s1 = inlined_call_operand.vmem [shape: bf16[36,128], index: 1, kind: input, shape index: {}]   ;;  %s1152_s2 = inlined_call_operand.vmem [shape: bf16[2,8,8,128], index: 2, kind: output, shape index: {0}]   ;;  %s1153_s3 = inlined_call_operand.hbm [shape: bf16[2,8,8,128], index: 3, kind: output, shape index: {1}]  }
   0x1   :  { %11 = vsyncpa [#allocation3 + $0x1], 0  ;;  %s908_s12 = smov 0   ;;  %s910_s13 = smov 0  }
   0x2   :  { %s912_s14 = smov 0   ;;  %s914_s15 = smov 0  }
   0x3   :  { %s916_s16 = smov 0   ;;  %s918_s17 = smov 0  }
   0x4 LB: > { %s626_s18 = sadd.s32 4294967295, %s884_s17   ;;  %s627_s19 = sadd.s32 4294967294, %s884_s17   ;;  %s884_s17 = sphi %s918_s17, %s17_s17   ;;  %s880_s16 = sphi %s916_s16, %s1166_s16   ;;  %s876_s15 = sphi %s914_s15, %s1165_s15   ;;  %s872_s14 = sphi %s912_s14, %s1164_s14   ;;  %s868_s13 = sphi %s910_s13, %s1163_s13   ;;  %s864_s12 = sphi %s908_s12, %s1162_s12  }
   0x5   : > { %s29_s20 = sadd.s32 1, %s880_s16  ;;  %s115_s21 = sadd.s32 1, %s872_s14 }
   0x6   : > { %p31_p0 = scmp.ge.s32.totalorder %s29_s20, 2  ;;  %p125_p1 = scmp.ne.s32.totalorder %s872_s14, %s868_s13 }
   0x7   : > { %p126_p2 = scmp.eq.s32.totalorder %s626_s18, 1  ;;  %p131_p3 = scmp.ne.s32.totalorder %s868_s13, %s864_s12 }
   0x8   : > { %s1168_s20 = smov (%p31_p0, %s29_s20), 0  ;;  %p132_p5 = scmp.eq.s32.totalorder %s627_s19, 1 }
   0x9   : > { %p948_p4 = por %p126_p2, %p125_p1  ;;  %s110_s23 = ssub.s32 %s880_s16, %s1168_s20 }
   0xa   : > { %p630_p6 = scmp.ge.s32.totalorder %s884_s17, 1  ;;  %p113_p7 = scmp.eq.s32.totalorder %s110_s23, 0 }
   0xb   : > { %p955_p8 = por %p132_p5, %p131_p3  ;;  %p166_p9 = scmp.lt.s32.totalorder %s884_s17, 3 }
   0xc   : > { %s961_s25 = scalar_select %p113_p7, %s872_s14, %s115_s21  }
   0xd   : > { %p167_p10 = pnand %p630_p6, %p166_p9 }
   0xe   : > { %p204_p11 = scmp.lt.s32.totalorder (!%p167_p10), %s876_s15, 1  ;;  %s200_s19 = sand.u32 (!%p167_p10), 1, %s868_s13  }
   0xf   : > { %170 = sbr.rel (%p167_p10) target bundleno = 330 (0x14a), region = 28  ;;  %s631_s21 = sshll.u32 (!%p167_p10), %s200_s19, 5 }
  0x10   : > { %s1098_s23 = scalar_lea.vmem (!%p167_p10), [#allocation2], %s631_s21  ;;  %s677_s26 = sshll.u32 (!%p167_p10), %s876_s15, 5 }
  0x11   : > { %s507_s29 = sshll.u32 (!%p167_p10), %s1098_s23, 4  ;;  %s508_s29 = int_to_ptr.vmem [resolvable:$true] %s507_s29 }
  0x14   : > { %v237_v0 = vld [vmem:[%s1151_s1 + $0x10] sm:$0x3]  ;;  %vm286_vm0 = vcmask 1041408   ;;  %s968_s28 = scalar_select %p204_p11, %s876_s15, 1  ;;  %v676_v4 = vld [vmem:[%s1151_s1 + $0x8] sm:$0xff]  ;;  %v675_v5 = vld [vmem:[%s1151_s1] sm:$0xff] }
  0x15   : > { %v267_v1 = vunpack.c.l.b16 %v237_v0  ;;  %vm273_vm1 = vcmask 293888   ;;  %s506_s15 = scalar_lea.hbm %s1153_s3, %s677_s26 }
  0x16   : > { %s669_s4 = sshll.u32 %s968_s28, 5  ;;  %s509_s30 = sshll.u32 %s506_s15, 4  ;;  %s510_s30 = int_to_ptr.hbm [resolvable:$true] %s509_s30 }
  0x17   : > { %v270_v2 = vpack.c.b16 %v267_v1, %v267_v1  ;;  %s211_s9 = scalar_lea.vmem %s1150_s0, %s669_s4  ;;  %s221_s18 = scalar_lea.vmem %s1152_s2, %s669_s4 }
  0x18   : > { %v671_v6 = vld [vmem:[%s211_s9] sm:$0xff]  ;;  %v672_v7 = vld [vmem:[%s211_s9 + $0x8] sm:$0xff]  ;;  %v673_v8 = vld [vmem:[%s211_s9 + $0x10] sm:$0xff]  ;;  %s489_s4 = scalar_lea.sflag [#allocation3], %s200_s19  ;;  %s820_s5 = sshra.s32 %s510_s30, 4  ;;  %s821_s5 = int_to_ptr.hbm [resolvable:$true] %s820_s5 }
  0x19   : > { %v288_v3 = vsel %vm286_vm0, %v270_v2, 0  ;;  %v674_v9 = vld [vmem:[%s211_s9 + $0x18] sm:$0xff]  ;;  %s822_s6 = scalar_lea.hbm %s821_s5, 32  ;;  %s826_s9 = scalar_lea.hbm %s1153_s3, 64 }
  0x1a   : > { %295 = vmatpush.bf16.msra.mxu0 %v288_v3  ;;  %724 = vmatpush.bf16.msra.mxu1 %v288_v3  ;;  %p823_p12 = scmp.ne.s32.totalorder %s821_s5, %s822_s6  ;;  %p827_p1 = scmp.lt.s32.totalorder %s821_s5, %s1153_s3 }
  0x1b   : > { %725 = vmatpush.bf16.msra.mxu2 %v288_v3  ;;  %726 = vmatpush.bf16.msra.mxu3 %v288_v3  ;;  %p828_p2 = scmp.lt.s32.totalorder %s826_s9, %s822_s6 }
  0x1c   : > { %p824_p13 = pnand %p823_p12, %p948_p4 }
  0x1d   : > { %p829_p3 = por %p828_p2, %p827_p1 }
  0x1e   : > { %296 = vmatpush.bf16.msra.mxu0 %v676_v4  ;;  %727 = vmatpush.bf16.msra.mxu1 %v676_v4  ;;  %p825_p0 = pneg %p824_p13 }
  0x1f   : > { %728 = vmatpush.bf16.msra.mxu2 %v676_v4  ;;  %729 = vmatpush.bf16.msra.mxu3 %v676_v4 }
  0x20   : > { %p830_p5 = pnand %p829_p3, %p825_p0 }
  0x22   : > { %297 = vmatpush.bf16.msra.mxu0 %v675_v5  ;;  %730 = vmatpush.bf16.msra.mxu1 %v675_v5 }
  0x23   : > { %731 = vmatpush.bf16.msra.mxu2 %v675_v5  ;;  %732 = vmatpush.bf16.msra.mxu3 %v675_v5 }
  0x25   : > { %660 = vmatmul.msk.bf16.vlgmr.msra.gmra.mxu0 %vm273_vm1, %v671_v6  ;;  %661 = vmatmul.msk.bf16.vlgmr.msra.gmra.mxu1 %vm273_vm1, %v672_v7 }
  0x26   : > { %662 = vmatmul.msk.bf16.vlgmr.msra.gmra.mxu2 %vm273_vm1, %v673_v8  ;;  %663 = vmatmul.msk.bf16.vlgmr.msra.gmra.mxu3 %vm273_vm1, %v674_v9 }
  0xa2   : > { %v299_v10 = vpop.f32.mrf.mxu0  ;;  %v304_v11 = vpop.f32.mrf.mxu1 }
  0xa3   : > { %v982_v12 = vmax.f32 %v299_v10, 0.0  ;;  %v984_v13 = vmax.f32 %v304_v11, 0.0 }
  0xa5   : > { %v345_v14 = vmul.f32 %v984_v13, %v984_v13  ;;  %v343_v15 = vmul.f32 %v982_v12, %v982_v12 }
  0xa7   : > { %355 = vadd.xlane.f32.xlu1 %v345_v14  ;;  %351 = vadd.xlane.f32.xlu0 %v343_v15 }
  0xa9   : > { %v309_v16 = vpop.f32.mrf.mxu2  ;;  %v314_v17 = vpop.f32.mrf.mxu3 }
  0xaa   : > { %v990_v18 = vmax.f32 %v309_v16, 0.0  ;;  %v301_v19 = vpop.f32.mrf.mxu0  ;;  %v306_v20 = vpop.f32.mrf.mxu1  ;;  %v1011_v28 = vmax.f32 %v314_v17, 0.0 }
  0xab   : > { %v992_v21 = vmax.f32 %v301_v19, 0.0  ;;  %v994_v22 = vmax.f32 %v306_v20, 0.0 }
  0xac   : > { %v347_v23 = vmul.f32 %v990_v18, %v990_v18  ;;  %v349_v37 = vmul.f32 %v1011_v28, %v1011_v28 }
  0xad   : > { %v681_v24 = vpack.c.bf16 %v992_v21, %v982_v12  ;;  %v686_v25 = vpack.c.bf16 %v994_v22, %v984_v13  ;;  %v346_v26 = vmul.f32 %v994_v22, %v994_v22  ;;  %v344_v27 = vmul.f32 %v992_v21, %v992_v21 }
  0xae   : > { %359 = vadd.xlane.f32.xlu2 %v347_v23 }
  0xaf   : > { %682 = vst [vmem:[%s221_s18] sm:$0xff] %v681_v24   ;;  %357 = vadd.xlane.f32.xlu1 %v346_v26  ;;  %353 = vadd.xlane.f32.xlu0 %v344_v27 }
  0xb0   : > { %718 = vst [vmem:[%s221_s18 + $0x8] sm:$0xff] %v686_v25  }
  0xb1   : > { %v311_v29 = vpop.f32.mrf.mxu2  ;;  %v316_v30 = vpop.f32.mrf.mxu3 }
  0xb2   : > { %v1013_v31 = vmax.f32 %v311_v29, 0.0  ;;  %v1015_v32 = vmax.f32 %v316_v30, 0.0 }
  0xb4   : > { %v691_v33 = vpack.c.bf16 %v1013_v31, %v990_v18  ;;  %v696_v34 = vpack.c.bf16 %v1015_v32, %v1011_v28  ;;  %v348_v35 = vmul.f32 %v1013_v31, %v1013_v31  ;;  %v350_v36 = vmul.f32 %v1015_v32, %v1015_v32 }
  0xb6   : > { %719 = vst [vmem:[%s221_s18 + $0x10] sm:$0xff] %v691_v33   ;;  %361 = vadd.xlane.f32.xlu2 %v348_v35 }
  0xb7   : > { %720 = vst [vmem:[%s221_s18 + $0x18] sm:$0xff] %v696_v34   ;;  %365 = vadd.xlane.f32.xlu1 %v350_v36  ;;  %363 = vadd.xlane.f32.xlu0 %v349_v37 }
 0x11a   : > { %v356_v38 = vpop.xlane.xlu1 %355  ;;  %v352_v39 = vpop.xlane.xlu0 %351 }
 0x11b   : > { %v369_v40 = vmax.f32 %v356_v38, 1e-24  ;;  %v367_v41 = vmax.f32 %v352_v39, 1e-24 }
 0x11d   : > { %790 = vrsqrt.f32 %v369_v40  ;;  %vm401_vm3 = vweird.f32 %v369_v40  ;;  %vm381_vm4 = vweird.f32 %v367_v41 }
 0x11e   : > { %792 = vrsqrt.f32 %v367_v41 }
 0x121   : > { %v360_v42 = vpop.xlane.xlu2 %359 }
 0x122   : > { %v1027_v43 = vmax.f32 %v360_v42, 1e-24  ;;  %v358_v44 = vpop.xlane.xlu1 %357  ;;  %v354_v45 = vpop.xlane.xlu0 %353 }
 0x123   : > { %v1029_v46 = vpop.eup %790  ;;  %v370_v47 = vmax.f32 %v358_v44, 1e-24  ;;  %v1031_v48 = vmax.f32 %v354_v45, 1e-24 }
 0x124   : > { %v1033_v49 = vpop.eup %792  ;;  %v396_v50 = vmul.f32 %v1029_v46, %v369_v40  ;;  %794 = vrsqrt.f32 %v1027_v43  ;;  %vm402_vm2 = vweird.f32 %v1029_v46  ;;  %vm421_vm15 = vweird.f32 %v1027_v43 }
 0x125   : > { %v376_v51 = vmul.f32 %v1033_v49, %v367_v41  ;;  %796 = vrsqrt.f32 %v370_v47  ;;  %vm382_vm5 = vweird.f32 %v1033_v49  ;;  %vm1059_vm6 = vmor %vm401_vm3, %vm402_vm2  ;;  %vm411_vm10 = vweird.f32 %v370_v47 }
 0x126   : > { %v397_v52 = vmul.f32 %v1029_v46, %v396_v50  ;;  %798 = vrsqrt.f32 %v1031_v48  ;;  %vm1070_vm9 = vmor %vm381_vm4, %vm382_vm5  ;;  %vm391_vm11 = vweird.f32 %v1031_v48 }
 0x127   : > { %v377_v53 = vmul.f32 %v1033_v49, %v376_v51 }
 0x128   : > { %v398_v54 = vmul.f32 0.5, %v397_v52 }
 0x129   : > { %v378_v55 = vmul.f32 0.5, %v377_v53  ;;  %v362_v56 = vpop.xlane.xlu2 %361 }
 0x12a   : > { %v1041_v57 = vpop.eup %794  ;;  %v1043_v58 = vmax.f32 %v362_v56, 1e-24  ;;  %v366_v59 = vpop.xlane.xlu1 %365  ;;  %v399_v61 = vsub.f32 1.5, %v398_v54 }
 0x12b   : > { %v797_v60 = vpop.eup %796  ;;  %v416_v62 = vmul.f32 %v1041_v57, %v1027_v43  ;;  %v1047_v63 = vmax.f32 %v366_v59, 1e-24  ;;  %v379_v2 = vsub.f32 1.5, %v378_v55  ;;  %v364_v5 = vpop.xlane.xlu0 %363  ;;  %vm422_vm13 = vweird.f32 %v1041_v57 }
 0x12c   : > { %v799_v0 = vpop.eup %798  ;;  %v406_v1 = vmul.f32 %v797_v60, %v370_v47  ;;  %800 = vrsqrt.f32 %v1043_v58  ;;  %v400_v7 = vmul.f32 %v1029_v46, %v399_v61  ;;  %v1055_v11 = vmax.f32 %v364_v5, 1e-24  ;;  %vm1089_vm1 = vmor %vm421_vm15, %vm422_vm13 }
 0x12d   : > { %v417_v3 = vmul.f32 %v1041_v57, %v416_v62  ;;  %v386_v4 = vmul.f32 %v799_v0, %v1031_v48  ;;  %802 = vrsqrt.f32 %v1047_v63  ;;  %v380_v14 = vmul.f32 %v1033_v49, %v379_v2 }
 0x12e   : > { %v407_v6 = vmul.f32 %v797_v60, %v406_v1  ;;  %vm412_vm7 = vweird.f32 %v797_v60  ;;  %804 = vrsqrt.f32 %v1055_v11  ;;  %v404_v23 = vsel %vm1059_vm6, %v1029_v46, %v400_v7 }
 0x12f   : > { %v418_v8 = vmul.f32 0.5, %v417_v3  ;;  %v387_v9 = vmul.f32 %v799_v0, %v386_v4  ;;  %vm392_vm8 = vweird.f32 %v799_v0  ;;  %v384_v30 = vsel %vm1070_vm9, %v1033_v49, %v380_v14  ;;  %vm413_vm12 = vmor %vm411_vm10, %vm412_vm7 }
 0x130   : > { %v408_v10 = vmul.f32 0.5, %v407_v6  ;;  %v457_v36 = vmul.f32 %v404_v23, %v984_v13  ;;  %vm393_vm14 = vmor %vm391_vm11, %vm392_vm8  ;;  %v455_v45 = vmul.f32 %v384_v30, %v982_v12  ;;  %vm431_vm2 = vweird.f32 %v1043_v58 }
 0x131   : > { %v388_v15 = vmul.f32 0.5, %v387_v9  ;;  %v419_v19 = vsub.f32 1.5, %v418_v8  ;;  %vm451_vm5 = vweird.f32 %v1047_v63  ;;  %vm441_vm8 = vweird.f32 %v1055_v11 }
 0x132   : > { %v801_v16 = vpop.eup %800  ;;  %v409_v20 = vsub.f32 1.5, %v408_v10 }
 0x133   : > { %v389_v24 = vsub.f32 1.5, %v388_v15  ;;  %v426_v25 = vmul.f32 %v801_v16, %v1043_v58  ;;  %v803_v26 = vpop.eup %802  ;;  %v420_v37 = vmul.f32 %v1041_v57, %v419_v19  ;;  %vm432_vm0 = vweird.f32 %v801_v16 }
 0x134   : > { %v410_v29 = vmul.f32 %v797_v60, %v409_v20  ;;  %v446_v35 = vmul.f32 %v803_v26, %v1047_v63  ;;  %v805_v44 = vpop.eup %804  ;;  %vm452_vm3 = vweird.f32 %v803_v26  ;;  %vm433_vm4 = vmor %vm431_vm2, %vm432_vm0 }
 0x135   : > { %v390_v33 = vmul.f32 %v799_v0, %v389_v24  ;;  %v427_v34 = vmul.f32 %v801_v16, %v426_v25  ;;  %v424_v50 = vsel %vm1089_vm1, %v1041_v57, %v420_v37  ;;  %vm453_vm6 = vmor %vm451_vm5, %vm452_vm3  ;;  %vm442_vm7 = vweird.f32 %v805_v44 }
 0x136   : > { %v414_v38 = vsel %vm413_vm12, %v797_v60, %v410_v29  ;;  %v447_v42 = vmul.f32 %v803_v26, %v446_v35  ;;  %v459_v55 = vmul.f32 %v424_v50, %v990_v18  ;;  %vm443_vm9 = vmor %vm441_vm8, %vm442_vm7 }
 0x137   : > { %v458_v39 = vmul.f32 %v414_v38, %v994_v22  ;;  %v394_v40 = vsel %vm393_vm14, %v799_v0, %v390_v33  ;;  %v428_v41 = vmul.f32 0.5, %v427_v34  ;;  %v436_v22 = vmul.f32 %v805_v44, %v1055_v11 }
 0x138   : > { %v456_v46 = vmul.f32 %v394_v40, %v992_v21  ;;  %v448_v49 = vmul.f32 0.5, %v447_v42 }
 0x139   : > { %v706_v47 = vpack.c.bf16 %v458_v39, %v457_v36  ;;  %v429_v48 = vsub.f32 1.5, %v428_v41  ;;  %v437_v51 = vmul.f32 %v805_v44, %v436_v22 }
 0x13a   : > { %v701_v12 = vpack.c.bf16 %v456_v46, %v455_v45  ;;  %v449_v43 = vsub.f32 1.5, %v448_v49 }
 0x13b   : > { %721 = vst [vmem:[%s1098_s23 + $0x8] sm:$0xff] %v706_v47   ;;  %v430_v21 = vmul.f32 %v801_v16, %v429_v48  ;;  %v438_v54 = vmul.f32 0.5, %v437_v51 }
 0x13c   : > { %702 = vst [vmem:[%s1098_s23] sm:$0xff] %v701_v12   ;;  %v450_v53 = vmul.f32 %v803_v26, %v449_v43 }
 0x13d   : > { %v434_v52 = vsel %vm433_vm4, %v801_v16, %v430_v21  ;;  %v439_v58 = vsub.f32 1.5, %v438_v54 }
 0x13e   : > { %v460_v56 = vmul.f32 %v434_v52, %v1013_v31  ;;  %v454_v57 = vsel %vm453_vm6, %v803_v26, %v450_v53 }
 0x13f   : > { %v440_v60 = vmul.f32 %v805_v44, %v439_v58  ;;  %v462_v18 = vmul.f32 %v454_v57, %v1015_v32 }
 0x140   : > { %v711_v59 = vpack.c.bf16 %v460_v56, %v459_v55 }
 0x141   : > { %v444_v31 = vsel %vm443_vm9, %v805_v44, %v440_v60 }
 0x142   : > { %722 = vst [vmem:[%s1098_s23 + $0x10] sm:$0xff] %v711_v59   ;;  %v461_v61 = vmul.f32 %v444_v31, %v1011_v28 }
 0x144   : > { %v716_v62 = vpack.c.bf16 %v462_v18, %v461_v61 }
 0x146   : > { %723 = vst [vmem:[%s1098_s23 + $0x18] sm:$0xff] %v716_v62  }
 0x147   : > { %833 = shalt.err (!%p830_p5)
}
 0x148   : > { %s886_s18 = smov 64   ;;  %s887_s19 = smov 4  }
 0x149   : > { %733 = dma.vmem_to_hbm [thread:$0]  (%p948_p4), %s508_s29, 512, %s510_s30, %s489_s4, %s886_s18, %s886_s18, %s887_s19  }
 0x14a PF: > { %p739_p6 = scmp.ge.s32.totalorder %s884_s17, 2  ;;  %s536_s21 = sand.u32 1, %s864_s12  }
 0x14b   : > { %s537_s23 = scalar_lea.sflag [#allocation3], %s536_s21 }
 0x14c   : > { %p736_p7 = pnand %p739_p6, %p955_p8 }
 0x14e   : > { %p737_p9 = pneg %p736_p7 }
 0x150   : > { %859 = dma.done.wait (%p737_p9), %s537_s23, 512  }
 0x151   : > { %861 = vsyncadd (%p737_p9), %s537_s23, 4294966784  ;;  %s17_s17 = sadd.s32 1, %s884_s17   ;;  %s1162_s12 = smov %s868_s13 }
 0x152   : > { %p14_p10 = scmp.ge.s32.totalorder %s17_s17, 4   ;;  %s1163_s13 = smov %s872_s14 }
 0x153   : > { %s1164_s14 = smov %s961_s25  ;;  %s1165_s15 = smov %s880_s16 }
 0x154   : > { %s1166_s16 = smov %s1168_s20  ;;  %16 = sbr.rel (!%p14_p10) target bundleno = 4 (0x4), region = 75 }
 0x159   :  { %543 = vsyncpa [#allocation3], 1 }
 0x15a   :  { %545 = vsyncpa [#allocation3 + $0x1], 1 }

// kernel: base_forward.3
= control target key start
LH: loop header
LB: loop body
LE: loop exit
PB: predicated region body
PF: predicated region fallthrough
CT: control target
= control target key end

     0   :  { %s2595_s24 = smov 0   ;;  %s2597_s25 = smov 0   ;;  %s3013_s0 = inlined_call_operand.vmem [shape: bf16[2,5,9,128], index: 0, kind: input, shape index: {}, may-alias: {0,1}]   ;;  %s3014_s1 = inlined_call_operand.vmem [shape: bf16[2,5,9,128], index: 1, kind: input, shape index: {}, may-alias: {0,1}]   ;;  %s3015_s2 = inlined_call_operand.vmem [shape: bf16[2,5,9,128], index: 2, kind: input, shape index: {}, may-alias: {2,3}]   ;;  %s3016_s3 = inlined_call_operand.vmem [shape: bf16[2,5,9,128], index: 3, kind: input, shape index: {}, may-alias: {2,3}]   ;;  %s3017_s4 = inlined_call_operand.vmem [shape: bf16[2,5,9,128], index: 4, kind: input, shape index: {}]   ;;  %s3018_s5 = inlined_call_operand.vmem [shape: bf16[2,5,9,128], index: 5, kind: input, shape index: {}]   ;;  %s3019_s6 = inlined_call_operand.vmem [shape: bf16[3,3,128,128], index: 6, kind: input, shape index: {}]   ;;  %s3020_s7 = inlined_call_operand.vmem [shape: bf16[2,4,8,128], index: 7, kind: output, shape index: {}]  }
   0x1   :  { %s2599_s26 = smov 0  }
   0x2 LB: > { %s29_s27 = sadd.s32 1, %s2549_s25  ;;  %p1953_p0 = scmp.ge.s32.totalorder %s2553_s26, 1  ;;  %s2553_s26 = sphi %s2599_s26, %s17_s26   ;;  %s2549_s25 = sphi %s2597_s25, %s3026_s25   ;;  %s2545_s24 = sphi %s2595_s24, %s3025_s24  }
   0x3   : > { %p31_p1 = scmp.ge.s32.totalorder %s29_s27, 2  ;;  %p401_p2 = scmp.lt.s32.totalorder %s2553_s26, 3 }
   0x5   : > { %s3028_s27 = smov (%p31_p1, %s29_s27), 0  ;;  %p402_p3 = pnand %p1953_p0, %p401_p2 }
   0x6   : > { %p520_p4 = scmp.lt.s32.totalorder (!%p402_p3), %s2545_s24, 1 }
   0x7   : > { %405 = sbr.rel (%p402_p3) target bundleno = 392 (0x188), region = 48 }
   0xc   : > { %v2420_v0 = vld [vmem:[%s3019_s6 + $0x78] sm:$0xff]  ;;  %v2419_v4 = vld [vmem:[%s3019_s6 + $0x70] sm:$0xff]  ;;  %s3030_s24 = smov (!%p520_p4, %s2545_s24), 1  ;;  %v2418_v8 = vld [vmem:[%s3019_s6 + $0x68] sm:$0xff]  ;;  %vm852_vm0 = vsmask.f32 3328 }
   0xd   : > { %v2412_v1 = vld [vmem:[%s3019_s6 + $0x38] sm:$0xff]  ;;  %754 = vmatpush.bf16.msra.mxu0 %v2420_v0  ;;  %v2411_v5 = vld [vmem:[%s3019_s6 + $0x30] sm:$0xff]  ;;  %s2640_s21 = smul.u32 40, %s3030_s24  ;;  %v2410_v9 = vld [vmem:[%s3019_s6 + $0x28] sm:$0xff]  ;;  %vm853_vm1 = vsmask.f32 7440 }
   0xe   : > { %v2428_v2 = vld [vmem:[%s3019_s6 + $0xb8] sm:$0xff]  ;;  %833 = vmatpush.bf16.msra.mxu1 %v2412_v1  ;;  %v2427_v6 = vld [vmem:[%s3019_s6 + $0xb0] sm:$0xff]  ;;  %v2426_v10 = vld [vmem:[%s3019_s6 + $0xa8] sm:$0xff]  ;;  %s2400_s12 = sshll.u32 %s3030_s24, 4 }
   0xf   : > { %v2436_v3 = vld [vmem:[%s3019_s6 + $0xf8] sm:$0xff]  ;;  %984 = vmatpush.bf16.msra.mxu2 %v2428_v2  ;;  %v2435_v7 = vld [vmem:[%s3019_s6 + $0xf0] sm:$0xff]  ;;  %v2434_v11 = vld [vmem:[%s3019_s6 + $0xe8] sm:$0xff]  ;;  %s2658_s13 = scalar_lea.vmem %s3013_s0, %s2640_s21  ;;  %s2706_s19 = scalar_lea.vmem %s3015_s2, %s2640_s21 }
  0x10   : > { %1084 = vmatpush.bf16.msra.mxu3 %v2436_v3  ;;  %v2417_v12 = vld [vmem:[%s3019_s6 + $0x60] sm:$0xff]  ;;  %v2676_v17 = vld [vmem:[%s2658_s13 + $0x8] sm:$0xf]  ;;  %v637_v20 = vld [vmem:[%s2658_s13 + $0xc] sm:$0x1]  ;;  %s2751_s17 = scalar_lea.vmem %s3017_s4, %s2640_s21 }
  0x11   : > { %755 = vmatpush.bf16.msra.mxu0 %v2419_v4  ;;  %v2409_v13 = vld [vmem:[%s3019_s6 + $0x20] sm:$0xff]  ;;  %v870_v22 = vshrl.u32 %v2676_v17, 16  ;;  %v873_v23 = vshll.u32 %v2676_v17, 16  ;;  %v2416_v24 = vld [vmem:[%s3019_s6 + $0x58] sm:$0xff]  ;;  %v879_v33 = vshll.u32 %v637_v20, 16  ;;  %v2415_v36 = vld [vmem:[%s3019_s6 + $0x50] sm:$0xff]  ;;  %v778_v0 = vunpack.c.l.b16 %v2676_v17 }
  0x12   : > { %834 = vmatpush.bf16.msra.mxu1 %v2411_v5  ;;  %v2425_v14 = vld [vmem:[%s3019_s6 + $0xa0] sm:$0xff]  ;;  %v2408_v25 = vld [vmem:[%s3019_s6 + $0x18] sm:$0xff]  ;;  %v2407_v37 = vld [vmem:[%s3019_s6 + $0x10] sm:$0xff] }
  0x13   : > { %985 = vmatpush.bf16.msra.mxu2 %v2427_v6  ;;  %v2433_v15 = vld [vmem:[%s3019_s6 + $0xe0] sm:$0xff]  ;;  %v2424_v28 = vld [vmem:[%s3019_s6 + $0x98] sm:$0xff]  ;;  %v872_v31 = vrot.slane %v870_v22, 4  ;;  %v875_v32 = vrot.slane %v873_v23, 5  ;;  %v2423_v39 = vld [vmem:[%s3019_s6 + $0x90] sm:$0xff]  ;;  %v881_v44 = vrot.slane %v879_v33, 5 }
  0x14   : > { %1085 = vmatpush.bf16.msra.mxu3 %v2435_v7  ;;  %v2673_v16 = vld [vmem:[%s2658_s13] sm:$0xf]  ;;  %v635_v19 = vld [vmem:[%s2658_s13 + $0x4] sm:$0x1]  ;;  %v2432_v29 = vld [vmem:[%s3019_s6 + $0xd8] sm:$0xff] }
  0x15   : > { %756 = vmatpush.bf16.msra.mxu0 %v2418_v8  ;;  %v856_v18 = vshrl.u32 %v2673_v16, 16  ;;  %v859_v21 = vshll.u32 %v2673_v16, 16  ;;  %v865_v27 = vshll.u32 %v635_v19, 16  ;;  %v876_v35 = vor.u32 %v875_v32, %v872_v31  ;;  %v2431_v40 = vld [vmem:[%s3019_s6 + $0xd0] sm:$0xff]  ;;  %vm2714_vm2 = vmor %vm852_vm0, %vm853_vm1  ;;  %v642_v46 = vld [vmem:[%s2706_s19] sm:$0xf] }
  0x16   : > { %835 = vmatpush.bf16.msra.mxu1 %v2410_v9  ;;  %v2719_v45 = vld [vmem:[%s2658_s13 + $0x10] sm:$0xf]  ;;  %v2723_v47 = vld [vmem:[%s2706_s19 + $0x8] sm:$0xf]  ;;  %v2726_v48 = vld [vmem:[%s2658_s13 + $0x18] sm:$0xf]  ;;  %v698_v58 = vunpack.c.l.b16 %v642_v46  ;;  %v777_v63 = vunpack.c.l.b16 %v2673_v16 }
  0x17   : > { %986 = vmatpush.bf16.msra.mxu2 %v2426_v10  ;;  %v858_v26 = vrot.slane %v856_v18, 4  ;;  %v861_v30 = vrot.slane %v859_v21, 5  ;;  %v867_v38 = vrot.slane %v865_v27, 5  ;;  %v877_v43 = vrot.slane %v876_v35, 4  ;;  %v2414_v49 = vld [vmem:[%s3019_s6 + $0x48] sm:$0xff]  ;;  %v2413_v61 = vld [vmem:[%s3019_s6 + $0x40] sm:$0xff] }
  0x18   : > { %1086 = vmatpush.bf16.msra.mxu3 %v2434_v11  ;;  %v2406_v50 = vld [vmem:[%s3019_s6 + $0x8] sm:$0xff]  ;;  %v884_v55 = vshrl.u32 %v2719_v45, 16  ;;  %v887_v56 = vshll.u32 %v2719_v45, 16  ;;  %v898_v57 = vshrl.u32 %v2726_v48, 16  ;;  %v699_v59 = vunpack.c.l.b16 %v2723_v47  ;;  %v2405_v62 = vld [vmem:[%s3019_s6] sm:$0xff]  ;;  %v2451_v27 = vld [vmem:[%s3019_s6 + $0x170] sm:$0xff] }
  0x19   : > { %757 = vmatpush.bf16.msra.mxu0 %v2417_v12  ;;  %v862_v34 = vor.u32 %v861_v30, %v858_v26  ;;  %v2422_v52 = vld [vmem:[%s3019_s6 + $0x88] sm:$0xff]  ;;  %v882_v54 = vsel %vm2714_vm2, %v877_v43, %v881_v44  ;;  %v901_v60 = vshll.u32 %v2726_v48, 16  ;;  %v2421_v3 = vld [vmem:[%s3019_s6 + $0x80] sm:$0xff]  ;;  %v639_v9 = vld [vmem:[%s2658_s13 + $0x14] sm:$0x1]  ;;  %v781_v16 = vpack.c.b16 %v778_v0, %v777_v63 }
  0x1a   : > { %836 = vmatpush.bf16.msra.mxu1 %v2409_v13  ;;  %v2430_v53 = vld [vmem:[%s3019_s6 + $0xc8] sm:$0xff]  ;;  %v886_v1 = vrot.slane %v884_v55, 4  ;;  %v889_v2 = vrot.slane %v887_v56, 5  ;;  %v2429_v4 = vld [vmem:[%s3019_s6 + $0xc0] sm:$0xff]  ;;  %v2769_v6 = vunpack.c.l.b16 %v882_v54  ;;  %v900_v7 = vrot.slane %v898_v57, 4  ;;  %v2444_v13 = vld [vmem:[%s3019_s6 + $0x138] sm:$0xff] }
  0x1b   : > { %987 = vmatpush.bf16.msra.mxu2 %v2425_v14  ;;  %v863_v42 = vrot.slane %v862_v34, 4  ;;  %v903_v8 = vrot.slane %v901_v60, 5  ;;  %v2108_v10 = vld [vmem:[%s2751_s17] sm:$0xf]  ;;  %v2401_v11 = vld [vmem:[%s2751_s17 + $0x4] sm:$0xf0]  ;;  %v779_v56 = vunpack.c.l.b16 %v2719_v45  ;;  %v780_v57 = vunpack.c.l.b16 %v2726_v48 }
  0x1c   : > { %1087 = vmatpush.bf16.msra.mxu3 %v2433_v15  ;;  %v641_v12 = vld [vmem:[%s2658_s13 + $0x1c] sm:$0x1]  ;;  %v702_v15 = vpack.c.b16 %v699_v59, %v698_v58  ;;  %v890_v18 = vor.u32 %v889_v2, %v886_v1  ;;  %v893_v19 = vshll.u32 %v639_v9, 16  ;;  %v2109_v21 = vor.u32 %v2401_v11, %v2108_v10  ;;  %v2443_v26 = vld [vmem:[%s3019_s6 + $0x130] sm:$0xff]  ;;  %v646_v32 = vld [vmem:[%s2751_s17] sm:$0xf]  ;;  %s2898_s13 = scalar_lea.vmem %s3018_s5, %s2640_s21 }
  0x1d   : > { %758 = vmatpush.bf16.msra.mxu0 %v2416_v24  ;;  %v868_v51 = vsel %vm2714_vm2, %v863_v42, %v867_v38  ;;  %v2452_v14 = vld [vmem:[%s3019_s6 + $0x178] sm:$0xff]  ;;  %v904_v22 = vor.u32 %v903_v8, %v900_v7  ;;  %v907_v23 = vshll.u32 %v641_v12, 16  ;;  %v2459_v33 = vld [vmem:[%s3019_s6 + $0x1b0] sm:$0xff]  ;;  %v648_v35 = vld [vmem:[%s2751_s17 + $0x8] sm:$0xf]  ;;  %v1208_v42 = vshrl.u32 %v646_v32, 16 }
  0x1e   : > { %837 = vmatpush.bf16.msra.mxu1 %v2408_v25  ;;  %v928_v5 = vunpack.c.l.b16 %v868_v51  ;;  %v2460_v24 = vld [vmem:[%s3019_s6 + $0x1b8] sm:$0xff]  ;;  %v2467_v34 = vld [vmem:[%s3019_s6 + $0x1f0] sm:$0xff]  ;;  %v1211_v44 = vshll.u32 %v646_v32, 16  ;;  %v1222_v46 = vshrl.u32 %v648_v35, 16  ;;  %v2466_v51 = vld [vmem:[%s3019_s6 + $0x1e8] sm:$0xff]  ;;  %v782_v12 = vpack.c.b16 %v780_v57, %v779_v56 }
  0x1f   : > { %988 = vmatpush.bf16.msra.mxu2 %v2424_v28  ;;  %v2468_v25 = vld [vmem:[%s3019_s6 + $0x1f8] sm:$0xff]  ;;  %v891_v28 = vrot.slane %v890_v18, 4  ;;  %v905_v30 = vrot.slane %v904_v22, 4  ;;  %v909_v31 = vrot.slane %v907_v23, 5  ;;  %v2813_v38 = vld [vmem:[%s2706_s19 + $0x10] sm:$0xf] }
  0x20   : > { %1088 = vmatpush.bf16.msra.mxu3 %v2432_v29  ;;  %v932_v20 = vpack.c.b16 %v2769_v6, %v928_v5  ;;  %v895_v29 = vrot.slane %v893_v19, 5  ;;  %v700_v54 = vunpack.c.l.b16 %v2813_v38  ;;  %v647_v63 = vld [vmem:[%s2751_s17 + $0x4] sm:$0x1]  ;;  %v1210_v1 = vrot.slane %v1208_v42, 4  ;;  %v649_v8 = vld [vmem:[%s2751_s17 + $0xc] sm:$0x1] }
  0x21   : > { %759 = vmatpush.bf16.msra.mxu0 %v2415_v36  ;;  %v2442_v36 = vld [vmem:[%s3019_s6 + $0x128] sm:$0xff]  ;;  %v910_v43 = vsel %vm2714_vm2, %v905_v30, %v909_v31  ;;  %v1213_v2 = vrot.slane %v1211_v44, 5  ;;  %v2457_v5 = vld [vmem:[%s3019_s6 + $0x1a0] sm:$0xff]  ;;  %v2440_v9 = vld [vmem:[%s3019_s6 + $0x118] sm:$0xff]  ;;  %v1231_v19 = vshll.u32 %v649_v8, 16 }
  0x22   : > { %838 = vmatpush.bf16.msra.mxu1 %v2407_v37  ;;  %v2450_v37 = vld [vmem:[%s3019_s6 + $0x168] sm:$0xff]  ;;  %v2840_v60 = vunpack.c.l.b16 %v910_v43  ;;  %v2465_v7 = vld [vmem:[%s3019_s6 + $0x1e0] sm:$0xff]  ;;  %v2448_v10 = vld [vmem:[%s3019_s6 + $0x158] sm:$0xff] }
  0x23   : > { %989 = vmatpush.bf16.msra.mxu2 %v2423_v39  ;;  %v2816_v39 = vld [vmem:[%s2706_s19 + $0x18] sm:$0xf]  ;;  %v2439_v22 = vld [vmem:[%s3019_s6 + $0x110] sm:$0xff]  ;;  %v2438_v32 = vld [vmem:[%s3019_s6 + $0x108] sm:$0xff] }
  0x24   : > { %1089 = vmatpush.bf16.msra.mxu3 %v2431_v40  ;;  %v896_v40 = vsel %vm2714_vm2, %v891_v28, %v895_v29  ;;  %v701_v55 = vunpack.c.l.b16 %v2816_v39  ;;  %v2447_v23 = vld [vmem:[%s3019_s6 + $0x150] sm:$0xff]  ;;  %v652_v31 = vld [vmem:[%s2751_s17 + $0x18] sm:$0xf]  ;;  %v2454_v43 = vld [vmem:[%s3019_s6 + $0x188] sm:$0xff] }
  0x25   : > { %760 = vmatpush.bf16.msra.mxu0 %v2414_v49  ;;  %v1225_v49 = vshll.u32 %v648_v35, 16  ;;  %v2838_v58 = vunpack.c.l.b16 %v896_v40  ;;  %v650_v28 = vld [vmem:[%s2751_s17 + $0x10] sm:$0xf]  ;;  %v1250_v40 = vshrl.u32 %v652_v31, 16  ;;  %v1253_v42 = vshll.u32 %v652_v31, 16  ;;  %v2462_v44 = vld [vmem:[%s3019_s6 + $0x1c8] sm:$0xff] }
  0x26   : > { %839 = vmatpush.bf16.msra.mxu1 %v2406_v50  ;;  %v2458_v50 = vld [vmem:[%s3019_s6 + $0x1a8] sm:$0xff]  ;;  %v703_v11 = vpack.c.b16 %v701_v55, %v700_v54  ;;  %v2455_v29 = vld [vmem:[%s3019_s6 + $0x190] sm:$0xff]  ;;  %v1239_v35 = vshll.u32 %v650_v28, 16  ;;  %v2472_v31 = vld [vmem:[%s3019_s6 + $0x218] sm:$0xff] }
  0x27   : > { %990 = vmatpush.bf16.msra.mxu2 %v2422_v52  ;;  %v2441_v52 = vld [vmem:[%s3019_s6 + $0x120] sm:$0xff]  ;;  %v2463_v30 = vld [vmem:[%s3019_s6 + $0x1d0] sm:$0xff]  ;;  %v2474_v38 = vld [vmem:[%s3019_s6 + $0x228] sm:$0xff] }
  0x28   : > { %1090 = vmatpush.bf16.msra.mxu3 %v2430_v53  ;;  %v2449_v53 = vld [vmem:[%s3019_s6 + $0x160] sm:$0xff]  ;;  %v2475_v17 = vld [vmem:[%s3019_s6 + $0x230] sm:$0xff]  ;;  %v2470_v48 = vld [vmem:[%s3019_s6 + $0x208] sm:$0xff] }
  0x29   : > { %761 = vmatpush.bf16.msra.mxu0 %v2413_v61  ;;  %v2112_v61 = vld [vmem:[%s2751_s17 + $0x10] sm:$0xf] }
  0x2a   : > { %840 = vmatpush.bf16.msra.mxu1 %v2405_v62  ;;  %v2402_v62 = vld [vmem:[%s2751_s17 + $0x14] sm:$0xf0] }
  0x2b   : > { %991 = vmatpush.bf16.msra.mxu2 %v2421_v3  ;;  %v1224_v3 = vrot.slane %v1222_v46, 4  ;;  %v2437_v46 = vld [vmem:[%s3019_s6 + $0x100] sm:$0xff] }
  0x2c   : > { %1091 = vmatpush.bf16.msra.mxu3 %v2429_v4  ;;  %762 = vmatmul.bf16.vlgmr.msra.gmra.mxu0 %v702_v15  ;;  %v1227_v4 = vrot.slane %v1225_v49, 5  ;;  %v933_v15 = vpack.c.b16 %v2840_v60, %v2838_v58  ;;  %v2445_v49 = vld [vmem:[%s3019_s6 + $0x140] sm:$0xff] }
  0x2d   : > { %1184 = vmatpush.bf16.msrb.mxu0 %v2444_v13  ;;  %841 = vmatmul.bf16.vlgmr.msra.gmra.mxu1 %v781_v16  ;;  %v2113_v13 = vor.u32 %v2402_v62, %v2112_v61  ;;  %v1214_v16 = vor.u32 %v1213_v2, %v1210_v1  ;;  %v2476_v61 = vld [vmem:[%s3019_s6 + $0x238] sm:$0xff]  ;;  %v2453_v62 = vld [vmem:[%s3019_s6 + $0x180] sm:$0xff]  ;;  %v1241_v1 = vrot.slane %v1239_v35, 5  ;;  %v1252_v2 = vrot.slane %v1250_v40, 4  ;;  %v2471_v40 = vld [vmem:[%s3019_s6 + $0x210] sm:$0xff] }
  0x2e   : > { %1336 = vmatpush.bf16.msrb.mxu1 %v2452_v14  ;;  %992 = vmatmul.bf16.vlgmr.msra.gmra.mxu2 %v932_v20  ;;  %v1217_v14 = vshll.u32 %v647_v63, 16  ;;  %v1228_v18 = vor.u32 %v1227_v4, %v1224_v3  ;;  %v2456_v20 = vld [vmem:[%s3019_s6 + $0x198] sm:$0xff]  ;;  %v1255_v3 = vrot.slane %v1253_v42, 5  ;;  %v2461_v4 = vld [vmem:[%s3019_s6 + $0x1c0] sm:$0xff] }
  0x2f   : > { %1092 = vmatmul.bf16.vlgmr.msra.gmra.mxu3 %v2109_v21  ;;  %1430 = vmatpush.bf16.msrb.mxu2 %v2460_v24  ;;  %v2464_v21 = vld [vmem:[%s3019_s6 + $0x1d8] sm:$0xff]  ;;  %v1215_v24 = vrot.slane %v1214_v16, 4 }
  0x30   : > { %1524 = vmatpush.bf16.msrb.mxu3 %v2468_v25  ;;  %v1219_v25 = vrot.slane %v1217_v14, 5  ;;  %v1256_v14 = vor.u32 %v1255_v3, %v1252_v2 }
  0x31   : > { %1185 = vmatpush.bf16.msrb.mxu0 %v2443_v26  ;;  %v1229_v26 = vrot.slane %v1228_v18, 4 }
  0x32   : > { %1337 = vmatpush.bf16.msrb.mxu1 %v2451_v27  ;;  %v1233_v27 = vrot.slane %v1231_v19, 5 }
  0x33   : > { %1431 = vmatpush.bf16.msrb.mxu2 %v2459_v33  ;;  %v2446_v33 = vld [vmem:[%s3019_s6 + $0x148] sm:$0xff] }
  0x34   : > { %1525 = vmatpush.bf16.msrb.mxu3 %v2467_v34  ;;  %v1236_v34 = vshrl.u32 %v650_v28, 16 }
  0x35   : > { %1186 = vmatpush.bf16.msrb.mxu0 %v2442_v36  ;;  %v1220_v36 = vsel %vm2714_vm2, %v1215_v24, %v1219_v25 }
  0x36   : > { %1338 = vmatpush.bf16.msrb.mxu1 %v2450_v37  ;;  %v1234_v37 = vsel %vm2714_vm2, %v1229_v26, %v1233_v27  ;;  %v1238_v63 = vrot.slane %v1236_v34, 4  ;;  %v2168_v26 = vld [vmem:[%s2898_s13 + $0x10] sm:$0xf]  ;;  %v2404_v27 = vld [vmem:[%s2898_s13 + $0x14] sm:$0xf0] }
  0x37   : > { %1432 = vmatpush.bf16.msrb.mxu2 %v2458_v50  ;;  %v2164_v50 = vld [vmem:[%s2898_s13] sm:$0xf] }
  0x38   : > { %1526 = vmatpush.bf16.msrb.mxu3 %v2466_v51  ;;  %v2403_v51 = vld [vmem:[%s2898_s13 + $0x4] sm:$0xf0] }
  0x39   : > { %1187 = vmatpush.bf16.msrb.mxu0 %v2441_v52  ;;  %v1280_v52 = vunpack.c.l.b16 %v1220_v36  ;;  %v2165_v8 = vor.u32 %v2403_v51, %v2164_v50 }
  0x3a   : > { %1339 = vmatpush.bf16.msrb.mxu1 %v2449_v53  ;;  %v1281_v53 = vunpack.c.l.b16 %v1234_v37 }
  0x3b   : > { %1433 = vmatpush.bf16.msrb.mxu2 %v2457_v5  ;;  %v651_v5 = vld [vmem:[%s2751_s17 + $0x14] sm:$0x1] }
  0x3c   : > { %1527 = vmatpush.bf16.msrb.mxu3 %v2465_v7  ;;  %767 = vmatmul.bf16.gmra.mxu0 %v703_v11  ;;  %v653_v7 = vld [vmem:[%s2751_s17 + $0x1c] sm:$0x1]  ;;  %v1472_v11 = vpack.c.b16 %v700_v54, %v699_v59  ;;  %s2397_s17 = sadd.s32 32, %s2640_s21  ;;  %v1257_v59 = vrot.slane %v1256_v14, 4 }
  0x3d   : > { %1188 = vmatpush.bf16.msrb.mxu0 %v2440_v9  ;;  %846 = vmatmul.bf16.gmra.mxu1 %v782_v12  ;;  %v1284_v9 = vpack.c.b16 %v1281_v53, %v1280_v52  ;;  %v1242_v12 = vor.u32 %v1241_v1, %v1238_v63  ;;  %s545_s15 = scalar_lea.vmem %s3014_s1, %s2397_s17  ;;  %s579_s22 = scalar_lea.vmem %s3016_s3, %s2397_s17 }
  0x3e   : > { %1340 = vmatpush.bf16.msrb.mxu1 %v2448_v10  ;;  %997 = vmatmul.bf16.gmra.mxu2 %v933_v15  ;;  %v1378_v10 = vpack.c.b16 %v779_v56, %v778_v0  ;;  %v1259_v15 = vshll.u32 %v653_v7, 16  ;;  %v658_v54 = vld [vmem:[%s545_s15] sm:$0xf] }
  0x3f   : > { %1097 = vmatmul.bf16.gmra.mxu3 %v2113_v13  ;;  %1434 = vmatpush.bf16.msrb.mxu2 %v2456_v20  ;;  %v1245_v13 = vshll.u32 %v651_v5, 16  ;;  %v1243_v45 = vrot.slane %v1242_v12, 4  ;;  %v1548_v56 = vshrl.u32 %v658_v54, 16  ;;  %v1551_v16 = vshll.u32 %v658_v54, 16  ;;  %v2473_v20 = vld [vmem:[%s3019_s6 + $0x220] sm:$0xff] }
  0x40   : > { %1528 = vmatpush.bf16.msrb.mxu3 %v2464_v21  ;;  %v1261_v0 = vrot.slane %v1259_v15, 5  ;;  %v660_v21 = vld [vmem:[%s579_s22] sm:$0xf]  ;;  %v1377_v28 = vunpack.c.l.b16 %v658_v54 }
  0x41   : > { %1189 = vmatpush.bf16.msrb.mxu0 %v2439_v22  ;;  %v1247_v47 = vrot.slane %v1245_v13, 5  ;;  %v1550_v24 = vrot.slane %v1548_v56, 4  ;;  %v1553_v25 = vrot.slane %v1551_v16, 5 }
  0x42   : > { %1341 = vmatpush.bf16.msrb.mxu1 %v2447_v23  ;;  %v1262_v19 = vsel %vm2714_vm2, %v1257_v59, %v1261_v0  ;;  %v1379_v36 = vpack.c.b16 %v1377_v28, %v780_v57 }
  0x43   : > { %1435 = vmatpush.bf16.msrb.mxu2 %v2455_v29  ;;  %v1248_v18 = vsel %vm2714_vm2, %v1243_v45, %v1247_v47  ;;  %v1283_v23 = vunpack.c.l.b16 %v1262_v19  ;;  %v1471_v29 = vunpack.c.l.b16 %v660_v21  ;;  %v1554_v34 = vor.u32 %v1553_v25, %v1550_v24 }
  0x44   : > { %1529 = vmatpush.bf16.msrb.mxu3 %v2463_v30  ;;  %v1282_v22 = vunpack.c.l.b16 %v1248_v18  ;;  %v659_v30 = vld [vmem:[%s545_s15 + $0x4] sm:$0x1]  ;;  %s632_s15 = scalar_lea.vmem %s3020_s7, %s2400_s12 }
  0x45   : > { %1190 = vmatpush.bf16.msrb.mxu0 %v2438_v32  ;;  %v2169_v32 = vor.u32 %v2404_v27, %v2168_v26  ;;  %v1557_v35 = vshll.u32 %v659_v30, 16  ;;  %v1473_v37 = vpack.c.b16 %v1471_v29, %v701_v55  ;;  %v1555_v42 = vrot.slane %v1554_v34, 4  ;;  %v2469_v55 = vld [vmem:[%s3019_s6 + $0x200] sm:$0xff] }
  0x46   : > { %1342 = vmatpush.bf16.msrb.mxu1 %v2446_v33  ;;  %v1285_v33 = vpack.c.b16 %v1283_v23, %v1282_v22  ;;  %v1663_v26 = vlaneseq }
  0x47   : > { %1436 = vmatpush.bf16.msrb.mxu2 %v2454_v43  ;;  %v1559_v43 = vrot.slane %v1557_v35, 5 }
  0x48   : > { %1530 = vmatpush.bf16.msrb.mxu3 %v2462_v44  ;;  %v1579_v44 = vpack.c.b16 %v2838_v58, %v2769_v6  ;;  %v1664_v34 = vshrl.u32 %v1663_v26, 7 }
  0x49   : > { %1191 = vmatpush.bf16.msrb.mxu0 %v2437_v46  ;;  %v1560_v39 = vsel %vm2714_vm2, %v1555_v42, %v1559_v43 }
  0x4a   : > { %1343 = vmatpush.bf16.msrb.mxu1 %v2445_v49  ;;  %v1578_v57 = vunpack.c.l.b16 %v1560_v39  ;;  %vm1669_vm3 = vcmp.lt.s32.totalorder %v1664_v34, 4 }
  0x4b   : > { %1437 = vmatpush.bf16.msrb.mxu2 %v2453_v62 }
  0x4c   : > { %1531 = vmatpush.bf16.msrb.mxu3 %v2461_v4  ;;  %1192 = vmatmul.bf16.vlgmr.msrb.gmra.mxu0 %v2165_v8  ;;  %v1580_v46 = vpack.c.b16 %v1578_v57, %v2840_v60 }
  0x4d   : > { %1631 = vmatpush.bf16.msra.mxu0 %v2476_v61  ;;  %1344 = vmatmul.bf16.vlgmr.msrb.gmra.mxu1 %v1284_v9 }
  0x4e   : > { %2488 = vmatpush.bf16.msra.mxu1 %v2476_v61  ;;  %1438 = vmatmul.bf16.vlgmr.msrb.gmra.mxu2 %v1378_v10 }
  0x4f   : > { %1532 = vmatmul.bf16.vlgmr.msrb.gmra.mxu3 %v1472_v11 }
  0x51   : > { %1632 = vmatpush.bf16.msra.mxu0 %v2475_v17 }
  0x52   : > { %2489 = vmatpush.bf16.msra.mxu1 %v2475_v17 }
  0x55   : > { %1633 = vmatpush.bf16.msra.mxu0 %v2474_v38 }
  0x56   : > { %2490 = vmatpush.bf16.msra.mxu1 %v2474_v38 }
  0x59   : > { %1634 = vmatpush.bf16.msra.mxu0 %v2473_v20 }
  0x5a   : > { %2491 = vmatpush.bf16.msra.mxu1 %v2473_v20 }
  0x5c   : > { %1197 = vmatmul.bf16.gmra.mxu0 %v2169_v32 }
  0x5d   : > { %1635 = vmatpush.bf16.msra.mxu0 %v2472_v31  ;;  %1349 = vmatmul.bf16.gmra.mxu1 %v1285_v33 }
  0x5e   : > { %2492 = vmatpush.bf16.msra.mxu1 %v2472_v31  ;;  %1443 = vmatmul.bf16.gmra.mxu2 %v1379_v36 }
  0x5f   : > { %1537 = vmatmul.bf16.gmra.mxu3 %v1473_v37 }
  0x61   : > { %1636 = vmatpush.bf16.msra.mxu0 %v2471_v40 }
  0x62   : > { %2493 = vmatpush.bf16.msra.mxu1 %v2471_v40 }
  0x65   : > { %1637 = vmatpush.bf16.msra.mxu0 %v2470_v48 }
  0x66   : > { %2494 = vmatpush.bf16.msra.mxu1 %v2470_v48 }
  0x69   : > { %1638 = vmatpush.bf16.msra.mxu0 %v2469_v55 }
  0x6a   : > { %2495 = vmatpush.bf16.msra.mxu1 %v2469_v55 }
  0x6c   : > { %1639 = vmatmul.bf16.vlgmr.msra.gmra.mxu0 %v1579_v44 }
  0x6d   : > { %1644 = vmatmul.bf16.vlgmr.msra.gmra.mxu1 %v1580_v46 }
  0xa9   : > { %v763_v49 = vpop.f32.mrf.mxu0 }
  0xaa   : > { %v842_v50 = vpop.f32.mrf.mxu1 }
  0xab   : > { %v843_v12 = vadd.f32 %v842_v50, %v763_v49 }
  0xb1   : > { %v993_v41 = vpop.f32.mrf.mxu2  ;;  %v765_v52 = vpop.f32.mrf.mxu0 }
  0xb2   : > { %v1093_v51 = vpop.f32.mrf.mxu3  ;;  %v844_v53 = vpop.f32.mrf.mxu1  ;;  %v1003_v14 = vadd.f32 %v993_v41, %v843_v12 }
  0xb3   : > { %v845_v54 = vadd.f32 %v844_v53, %v765_v52 }
  0xb4   : > { %v1103_v0 = vadd.f32 %v1093_v51, %v1003_v14 }
  0xb9   : > { %v995_v61 = vpop.f32.mrf.mxu2  ;;  %v768_v63 = vpop.f32.mrf.mxu0 }
  0xba   : > { %v1095_v62 = vpop.f32.mrf.mxu3  ;;  %v847_v1 = vpop.f32.mrf.mxu1  ;;  %v1004_v19 = vadd.f32 %v995_v61, %v845_v54 }
  0xbb   : > { %v848_v13 = vadd.f32 %v847_v1, %v768_v63 }
  0xbc   : > { %v1104_v27 = vadd.f32 %v1095_v62, %v1004_v19 }
  0xc1   : > { %v998_v2 = vpop.f32.mrf.mxu2  ;;  %v770_v4 = vpop.f32.mrf.mxu0 }
  0xc2   : > { %v1098_v3 = vpop.f32.mrf.mxu3  ;;  %v849_v5 = vpop.f32.mrf.mxu1  ;;  %v1005_v15 = vadd.f32 %v998_v2, %v848_v13 }
  0xc3   : > { %v850_v56 = vadd.f32 %v849_v5, %v770_v4 }
  0xc4   : > { %v1105_v38 = vadd.f32 %v1098_v3, %v1005_v15 }
  0xc9   : > { %v1000_v7 = vpop.f32.mrf.mxu2  ;;  %v1193_v58 = vpop.f32.mrf.mxu0 }
  0xca   : > { %v1100_v6 = vpop.f32.mrf.mxu3  ;;  %v1345_v60 = vpop.f32.mrf.mxu1  ;;  %v1203_v16 = vadd.f32 %v1193_v58, %v1103_v0  ;;  %v1006_v20 = vadd.f32 %v1000_v7, %v850_v56 }
  0xcc   : > { %v1355_v24 = vadd.f32 %v1345_v60, %v1203_v16  ;;  %v1106_v28 = vadd.f32 %v1100_v6, %v1006_v20 }
  0xd1   : > { %v1439_v8 = vpop.f32.mrf.mxu2  ;;  %v1195_v10 = vpop.f32.mrf.mxu0 }
  0xd2   : > { %v1533_v9 = vpop.f32.mrf.mxu3  ;;  %v1347_v11 = vpop.f32.mrf.mxu1  ;;  %v1449_v29 = vadd.f32 %v1439_v8, %v1355_v24  ;;  %v1204_v32 = vadd.f32 %v1195_v10, %v1104_v27 }
  0xd4   : > { %v1543_v35 = vadd.f32 %v1533_v9, %v1449_v29  ;;  %v1356_v43 = vadd.f32 %v1347_v11, %v1204_v32 }
  0xd9   : > { %v1441_v17 = vpop.f32.mrf.mxu2  ;;  %v1198_v45 = vpop.f32.mrf.mxu0 }
  0xda   : > { %v1350_v47 = vpop.f32.mrf.mxu1  ;;  %v1535_v59 = vpop.f32.mrf.mxu3  ;;  %v1205_v18 = vadd.f32 %v1198_v45, %v1105_v38  ;;  %v1450_v57 = vadd.f32 %v1441_v17, %v1356_v43 }
  0xdc   : > { %v1357_v25 = vadd.f32 %v1350_v47, %v1205_v18  ;;  %v1544_v61 = vadd.f32 %v1535_v59, %v1450_v57 }
  0xe1   : > { %v1444_v21 = vpop.f32.mrf.mxu2  ;;  %v1200_v22 = vpop.f32.mrf.mxu0 }
  0xe2   : > { %v1352_v23 = vpop.f32.mrf.mxu1  ;;  %v1451_v30 = vadd.f32 %v1444_v21, %v1357_v25  ;;  %v1538_v31 = vpop.f32.mrf.mxu3  ;;  %v1206_v33 = vadd.f32 %v1200_v22, %v1106_v28 }
  0xe4   : > { %v1545_v36 = vadd.f32 %v1538_v31, %v1451_v30  ;;  %v1358_v48 = vadd.f32 %v1352_v23, %v1206_v33 }
  0xe9   : > { %v1446_v37 = vpop.f32.mrf.mxu2  ;;  %v1640_v40 = vpop.f32.mrf.mxu0 }
  0xea   : > { %v1645_v42 = vpop.f32.mrf.mxu1  ;;  %v1650_v39 = vadd.f32 %v1640_v40, %v1543_v35  ;;  %v1452_v44 = vadd.f32 %v1446_v37, %v1358_v48  ;;  %v1540_v51 = vpop.f32.mrf.mxu3 }
  0xeb   : > { %v1652_v55 = vadd.f32 %v1645_v42, %v1545_v36 }
  0xec   : > { %v1654_v46 = vmax.f32 %v1650_v39, 0.0  ;;  %v1546_v62 = vadd.f32 %v1540_v51, %v1452_v44 }
  0xed   : > { %v1656_v49 = vmax.f32 %v1652_v55, 0.0 }
  0xee   : > { %v2984_v41 = vsel %vm1669_vm3, %v1654_v46, 0.0 }
  0xef   : > { %v2981_v50 = vsel %vm1669_vm3, %v1656_v49, 0.0  ;;  %v1686_v53 = vmul.f32 %v2984_v41, %v2984_v41 }
  0xf0   : > { %v1688_v52 = vmul.f32 %v2981_v50, %v2981_v50 }
  0xf1   : > { %v1642_v63 = vpop.f32.mrf.mxu0  ;;  %1690 = vadd.xlane.f32.xlu0 %v1686_v53 }
  0xf2   : > { %v1647_v1 = vpop.f32.mrf.mxu1  ;;  %1694 = vadd.xlane.f32.xlu1 %v1688_v52  ;;  %v1651_v2 = vadd.f32 %v1642_v63, %v1544_v61 }
  0xf3   : > { %v1653_v3 = vadd.f32 %v1647_v1, %v1546_v62 }
  0xf4   : > { %v1655_v4 = vmax.f32 %v1651_v2, 0.0 }
  0xf5   : > { %v1657_v5 = vmax.f32 %v1653_v3, 0.0 }
  0xf6   : > { %v1683_v6 = vsel %vm1669_vm3, %v1655_v4, 0.0 }
  0xf7   : > { %v1685_v7 = vsel %vm1669_vm3, %v1657_v5, 0.0  ;;  %v1687_v60 = vmul.f32 %v1683_v6, %v1683_v6 }
  0xf8   : > { %v1689_v58 = vmul.f32 %v1685_v7, %v1685_v7 }
  0xf9   : > { %1692 = vadd.xlane.f32.xlu0 %v1687_v60 }
  0xfa   : > { %1696 = vadd.xlane.f32.xlu1 %v1689_v58 }
 0x164   : > { %v1691_v9 = vpop.xlane.xlu0 %1690 }
 0x165   : > { %v1695_v8 = vpop.xlane.xlu1 %1694  ;;  %v1698_v11 = vmax.f32 %v1691_v9, 1e-24 }
 0x166   : > { %v1700_v10 = vmax.f32 %v1695_v8, 1e-24 }
 0x167   : > { %vm1708_vm9 = vweird.f32 %v1698_v11 }
 0x168   : > { %2523 = vrsqrt.f32 %v1700_v10  ;;  %vm1728_vm6 = vweird.f32 %v1700_v10 }
 0x169   : > { %2525 = vrsqrt.f32 %v1698_v11 }
 0x16c   : > { %v1693_v13 = vpop.xlane.xlu0 %1692 }
 0x16d   : > { %v1697_v12 = vpop.xlane.xlu1 %1696  ;;  %v1699_v17 = vmax.f32 %v1693_v13, 1e-24 }
 0x16e   : > { %v2524_v14 = vpop.eup %2523  ;;  %v1701_v15 = vmax.f32 %v1697_v12, 1e-24 }
 0x16f   : > { %v2526_v45 = vpop.eup %2525  ;;  %v1723_v47 = vmul.f32 %v2524_v14, %v1700_v10  ;;  %vm1729_vm4 = vweird.f32 %v2524_v14  ;;  %vm1718_vm14 = vweird.f32 %v1699_v17 }
 0x170   : > { %v1703_v59 = vmul.f32 %v2526_v45, %v1698_v11  ;;  %2527 = vrsqrt.f32 %v1701_v15  ;;  %vm1709_vm5 = vweird.f32 %v2526_v45  ;;  %vm2992_vm8 = vmor %vm1728_vm6, %vm1729_vm4  ;;  %vm1738_vm12 = vweird.f32 %v1701_v15 }
 0x171   : > { %v1724_v0 = vmul.f32 %v2524_v14, %v1723_v47  ;;  %2529 = vrsqrt.f32 %v1699_v17  ;;  %vm1710_vm11 = vmor %vm1708_vm9, %vm1709_vm5 }
 0x172   : > { %v1704_v38 = vmul.f32 %v2526_v45, %v1703_v59 }
 0x173   : > { %v1725_v54 = vmul.f32 0.5, %v1724_v0 }
 0x174   : > { %v1705_v56 = vmul.f32 0.5, %v1704_v38 }
 0x175   : > { %v1726_v19 = vsub.f32 1.5, %v1725_v54 }
 0x176   : > { %v2528_v16 = vpop.eup %2527  ;;  %v1706_v21 = vsub.f32 1.5, %v1705_v56 }
 0x177   : > { %v2530_v18 = vpop.eup %2529  ;;  %v1733_v20 = vmul.f32 %v2528_v16, %v1701_v15  ;;  %v1727_v25 = vmul.f32 %v2524_v14, %v1726_v19  ;;  %vm1739_vm7 = vweird.f32 %v2528_v16 }
 0x178   : > { %v1713_v22 = vmul.f32 %v2530_v18, %v1699_v17  ;;  %v1707_v27 = vmul.f32 %v2526_v45, %v1706_v21  ;;  %vm1719_vm10 = vweird.f32 %v2530_v18  ;;  %vm1740_vm13 = vmor %vm1738_vm12, %vm1739_vm7 }
 0x179   : > { %v1734_v23 = vmul.f32 %v2528_v16, %v1733_v20  ;;  %v1731_v32 = vsel %vm2992_vm8, %v2524_v14, %v1727_v25  ;;  %vm1720_vm15 = vmor %vm1718_vm14, %vm1719_vm10 }
 0x17a   : > { %v1714_v24 = vmul.f32 %v2530_v18, %v1713_v22  ;;  %v1711_v34 = vsel %vm1710_vm11, %v2526_v45, %v1707_v27  ;;  %v1744_v37 = vmul.f32 %v1731_v32, %v2981_v50 }
 0x17b   : > { %v1735_v26 = vmul.f32 0.5, %v1734_v23  ;;  %v1742_v43 = vmul.f32 %v1711_v34, %v2984_v41 }
 0x17c   : > { %v1715_v28 = vmul.f32 0.5, %v1714_v24 }
 0x17d   : > { %v1736_v29 = vsub.f32 1.5, %v1735_v26 }
 0x17e   : > { %v1716_v31 = vsub.f32 1.5, %v1715_v28 }
 0x17f   : > { %v1737_v33 = vmul.f32 %v2528_v16, %v1736_v29 }
 0x180   : > { %v1717_v35 = vmul.f32 %v2530_v18, %v1716_v31 }
 0x181   : > { %v1741_v36 = vsel %vm1740_vm13, %v2528_v16, %v1737_v33 }
 0x182   : > { %v1745_v40 = vmul.f32 %v1741_v36, %v1685_v7  ;;  %v1721_v42 = vsel %vm1720_vm15, %v2530_v18, %v1717_v35 }
 0x183   : > { %v1743_v48 = vmul.f32 %v1721_v42, %v1683_v6 }
 0x184   : > { %v2485_v39 = vpack.c.bf16 %v1745_v40, %v1744_v37 }
 0x185   : > { %v2480_v55 = vpack.c.bf16 %v1743_v48, %v1742_v43 }
 0x186   : > { %2487 = vst [vmem:[%s632_s15 + $0x8] sm:$0xff] %v2485_v39  }
 0x187   : > { %2481 = vst [vmem:[%s632_s15] sm:$0xff] %v2480_v55  }
 0x188 PF: > { %s17_s26 = sadd.s32 1, %s2553_s26   ;;  %s3025_s24 = smov %s2549_s25 }
 0x189   : > { %p14_p5 = scmp.ge.s32.totalorder %s17_s26, 4   ;;  %s3026_s25 = smov %s3028_s27 }
 0x18b   :  { %16 = sbr.rel (!%p14_p5) target bundleno = 2 (0x2), region = 101 }

</bundles_post_ra>
